<compile_context>
chip_gen: v7x
topology: tpu7x:2x2x1
jax: 0.10.0
libtpu: 0.0.40
codegen_flags: <defaults>
</compile_context>

<pallas_src>
import jax
import jax.numpy as jnp
from jax.experimental import pallas as pl
from jax.experimental.pallas import tpu as pltpu

B = 2              # batch (small demo size)
T = 30             # fixed by l3 = Linear(30*32, 250)
T_PAD = 32         # padded so all sublane splits are 8-aligned
D_IN = 1000        # fixed by l1 = Linear(1000, 128)
D_IN_PAD = 1024    # lane-dense / clean MXU K tiles
D_H1 = 128
D_H2 = 32
D_OUT = 250
D_OUT_PAD = 256    # lane-dense layer-3 output (wrapper slices back to 250)

# Packed weight-slab row offsets (all multiples of 8).
R_W1 = 0
R_W2 = D_IN_PAD                       # 1024
R_W3 = D_IN_PAD + D_H1                # 1152
N_SLAB_ROWS = R_W3 + T_PAD * D_H2     # 2176


def vidfeat_kernel(x_ref, w_ref, b_ref, out_ref):
    # x_ref: (B*T_PAD, D_IN_PAD) bf16, rows are b-major (row = b*T_PAD + t).
    x = x_ref[...]

    # Static slices of the packed bf16 weight slab (no relayout).
    w1 = w_ref[R_W1:R_W1 + D_IN_PAD, :D_H1]          # (1024, 128)
    w2 = w_ref[R_W2:R_W2 + D_H1, :D_H2]               # (128, 32)
    w3 = w_ref[R_W3:R_W3 + T_PAD * D_H2, :]           # (1024, 256)

    # Packed biases (f32): row 0 = b1, row 1 = b2, row 2 = b3 (zero-padded).
    b1 = b_ref[0:1, :D_H1]
    b2 = b_ref[1:2, :D_H2]
    b3 = b_ref[2:3, :]

    # Layer 1: bf16 MXU matmul, f32 accumulate; bias + ReLU in f32.
    h1 = jnp.dot(x, w1, preferred_element_type=jnp.float32)
    h1 = jnp.maximum(h1 + b1, 0.0).astype(jnp.bfloat16)          # (64, 128)

    # Layer 2.
    h2 = jnp.dot(h1, w2, preferred_element_type=jnp.float32)
    h2 = jnp.maximum(h2 + b2, 0.0).astype(jnp.bfloat16)          # (64, 32)

    # Layer 3 without the cross-lane flatten:
    #   f[b, o] = sum_{t,c} h2[b, t, c] * W3[t, c, o]
    # computed as a t-batched matmul + sum over t.  Both reshapes below split
    # rows on 8-aligned boundaries (lane dim unchanged) -> layout-free.
    h2b = h2.reshape(B, T_PAD, D_H2)                              # (2, 32, 32)
    w3b = w3.reshape(T_PAD, D_H2, D_OUT_PAD)                      # (32, 32, 256)
    h2t = jnp.transpose(h2b, (1, 0, 2))                           # (32, 2, 32) tiny
    p = jnp.einsum('tbc,tco->tbo', h2t, w3b,
                   preferred_element_type=jnp.float32)            # (32, 2, 256)
    out_ref[...] = jnp.maximum(jnp.sum(p, axis=0) + b3, 0.0)      # (2, 256) f32


def vidfeat_forward(x_rows, w_slab, biases):
    flops = 2 * (B * T_PAD * D_IN_PAD * D_H1
                 + B * T_PAD * D_H1 * D_H2
                 + T_PAD * B * D_H2 * D_OUT_PAD)
    bytes_accessed = (x_rows.size * 2 + w_slab.size * 2
                      + biases.size * 4 + B * D_OUT_PAD * 4)
    vmem_spec = pl.BlockSpec(memory_space=pltpu.MemorySpace.VMEM)
    out = pl.pallas_call(
        vidfeat_kernel,
        out_shape=jax.ShapeDtypeStruct((B, D_OUT_PAD), jnp.float32),
        in_specs=[vmem_spec, vmem_spec, vmem_spec],
        out_specs=vmem_spec,
        cost_estimate=pl.CostEstimate(
            flops=flops, transcendentals=0, bytes_accessed=bytes_accessed),
    )(x_rows, w_slab, biases)
    return out[:, :D_OUT]


def init_params(key):
    # PyTorch nn.Linear default init: U(-1/sqrt(fan_in), 1/sqrt(fan_in)).
    # Weights stored (in, out) so the kernel computes x @ W (== x @ weight.T).
    k1, k2, k3, k4, k5, k6 = jax.random.split(key, 6)

    def lin(kw, kb, fan_in, fan_out):
        bound = 1.0 / jnp.sqrt(fan_in)
        w = jax.random.uniform(kw, (fan_in, fan_out), jnp.float32, -bound, bound)
        b = jax.random.uniform(kb, (fan_out,), jnp.float32, -bound, bound)
        return w, b

    w1, b1 = lin(k1, k2, D_IN, D_H1)
    w2, b2 = lin(k3, k4, D_H1, D_H2)
    w3, b3 = lin(k5, k6, T * D_H2, D_OUT)
    return w1, b1, w2, b2, w3, b3


def pack_x(x):
    # Offline: bf16 cast, pad D_IN->1024 and T->32 with zeros, flatten rows
    # (b-major) so the kernel never reshapes the 3-D activation input.
    xp = jnp.zeros((B, T_PAD, D_IN_PAD), jnp.bfloat16)
    xp = xp.at[:, :T, :D_IN].set(x.astype(jnp.bfloat16))
    return xp.reshape(B * T_PAD, D_IN_PAD)


def pack_params(w1, b1, w2, b2, w3, b3):
    # One-time (offline) repacking into a single bf16 slab + f32 bias buffer.
    # W3 rows are already t-major/c-minor (matches torch .view(B, 30*32));
    # padded rows (t >= 30) and padded output columns stay zero, so the padded
    # timesteps / columns contribute exactly nothing.
    slab = jnp.zeros((N_SLAB_ROWS, D_OUT_PAD), jnp.float32)
    slab = slab.at[R_W1:R_W1 + D_IN, :D_H1].set(w1)
    slab = slab.at[R_W2:R_W2 + D_H1, :D_H2].set(w2)
    slab = slab.at[R_W3:R_W3 + T * D_H2, :D_OUT].set(w3)
    slab = slab.astype(jnp.bfloat16)

    biases = jnp.zeros((3, D_OUT_PAD), jnp.float32)
    biases = biases.at[0, :D_H1].set(b1)
    biases = biases.at[1, :D_H2].set(b2)
    biases = biases.at[2, :D_OUT].set(b3)
    return slab, biases


def reference_forward(x, w1, b1, w2, b2, w3, b3):
    # Same mixed precision as the kernel: bf16 operands, f32 accumulation.
    xb = x.astype(jnp.bfloat16).reshape(B * T, D_IN)
    h1 = jnp.dot(xb, w1.astype(jnp.bfloat16),
                 preferred_element_type=jnp.float32) + b1
    h1 = jnp.maximum(h1, 0.0).astype(jnp.bfloat16)
    h2 = jnp.dot(h1, w2.astype(jnp.bfloat16),
                 preferred_element_type=jnp.float32) + b2
    h2 = jnp.maximum(h2, 0.0).astype(jnp.bfloat16)
    h2f = h2.reshape(B, T * D_H2)
    h3 = jnp.dot(h2f, w3.astype(jnp.bfloat16),
                 preferred_element_type=jnp.float32) + b3
    return jnp.maximum(h3, 0.0)


if __name__ == "__main__":
    key = jax.random.PRNGKey(0)
    kx, kp = jax.random.split(key)
    x = jax.random.normal(kx, (B, T, D_IN), jnp.float32)
    w1, b1, w2, b2, w3, b3 = init_params(kp)

    x_rows = pack_x(x)
    w_slab, biases = pack_params(w1, b1, w2, b2, w3, b3)

    out = vidfeat_forward(x_rows, w_slab, biases)
    out = jax.block_until_ready(out)

    ref = reference_forward(x, w1, b1, w2, b2, w3, b3)
    assert out.shape == (B, D_OUT), out.shape
    max_err = float(jnp.max(jnp.abs(out - ref)))
    assert jnp.allclose(out, ref, atol=2e-2, rtol=2e-2), max_err
    print("KERNEL_OK")
</pallas_src>

<mosaic_0001>
module attributes {stable_mosaic.version = 11 : i64} {
  func.func @vidfeat_kernel(%arg0: memref<64x1024xbf16, #tpu.memory_space<vmem>>, %arg1: memref<2176x256xbf16, #tpu.memory_space<vmem>>, %arg2: memref<3x256xf32, #tpu.memory_space<vmem>>, %arg3: memref<2x256xf32, #tpu.memory_space<vmem>>) attributes {dimension_semantics = [], scalar_prefetch = 0 : i64, scratch_operands = 0 : i64, tpu.core_type = #tpu.core_type<tc>} {
    %c0 = arith.constant 0 : index
    %c0_0 = arith.constant 0 : index
    %0 = vector.load %arg0[%c0, %c0_0] : memref<64x1024xbf16, #tpu.memory_space<vmem>>, vector<64x1024xbf16>
    %c0_1 = arith.constant 0 : index
    %c0_2 = arith.constant 0 : index
    %1 = vector.load %arg1[%c0_1, %c0_2] : memref<2176x256xbf16, #tpu.memory_space<vmem>>, vector<1024x128xbf16>
    %c1024 = arith.constant 1024 : index
    %c0_3 = arith.constant 0 : index
    %2 = vector.load %arg1[%c1024, %c0_3] : memref<2176x256xbf16, #tpu.memory_space<vmem>>, vector<128x32xbf16>
    %c1152 = arith.constant 1152 : index
    %c0_4 = arith.constant 0 : index
    %3 = vector.load %arg1[%c1152, %c0_4] : memref<2176x256xbf16, #tpu.memory_space<vmem>>, vector<1024x256xbf16>
    %c0_5 = arith.constant 0 : index
    %c0_6 = arith.constant 0 : index
    %4 = vector.load %arg2[%c0_5, %c0_6] : memref<3x256xf32, #tpu.memory_space<vmem>>, vector<1x128xf32>
    %c1 = arith.constant 1 : index
    %c0_7 = arith.constant 0 : index
    %5 = vector.load %arg2[%c1, %c0_7] : memref<3x256xf32, #tpu.memory_space<vmem>>, vector<1x32xf32>
    %c2 = arith.constant 2 : index
    %c0_8 = arith.constant 0 : index
    %6 = vector.load %arg2[%c2, %c0_8] : memref<3x256xf32, #tpu.memory_space<vmem>>, vector<1x256xf32>
    %cst = arith.constant dense<0.000000e+00> : vector<64x128xf32>
    %7 = tpu.matmul %0, %1, %cst {dimension_numbers = #tpu.dot_dimension_numbers<[1], [0], [0], [1], [0, 0, 1, 1], [], []>} : vector<64x1024xbf16>, vector<1024x128xbf16>, vector<64x128xf32> -> vector<64x128xf32>
    %8 = vector.broadcast %4 : vector<1x128xf32> to vector<64x128xf32>
    %9 = arith.addf %7, %8 : vector<64x128xf32>
    %cst_9 = arith.constant 0.000000e+00 : f32
    %10 = vector.broadcast %cst_9 : f32 to vector<64x128xf32>
    %11 = arith.maximumf %9, %10 : vector<64x128xf32>
    %12 = arith.truncf %11 : vector<64x128xf32> to vector<64x128xbf16>
    %cst_10 = arith.constant dense<0.000000e+00> : vector<64x32xf32>
    %13 = tpu.matmul %12, %2, %cst_10 {dimension_numbers = #tpu.dot_dimension_numbers<[1], [0], [0], [1], [0, 0, 1, 1], [], []>} : vector<64x128xbf16>, vector<128x32xbf16>, vector<64x32xf32> -> vector<64x32xf32>
    %14 = vector.broadcast %5 : vector<1x32xf32> to vector<64x32xf32>
    %15 = arith.addf %13, %14 : vector<64x32xf32>
    %cst_11 = arith.constant 0.000000e+00 : f32
    %16 = vector.broadcast %cst_11 : f32 to vector<64x32xf32>
    %17 = arith.maximumf %15, %16 : vector<64x32xf32>
    %18 = arith.truncf %17 : vector<64x32xf32> to vector<64x32xbf16>
    %19 = vector.shape_cast %18 : vector<64x32xbf16> to vector<2x32x32xbf16>
    %20 = vector.shape_cast %3 : vector<1024x256xbf16> to vector<32x32x256xbf16>
    %21 = tpu.transpose %19, [1, 0, 2] : vector<2x32x32xbf16> -> vector<32x2x32xbf16>
    "tpu.trace_start"() <{level = 10 : i32, message = "tbc,tco->tbo"}> : () -> ()
    %cst_12 = arith.constant dense<0.000000e+00> : vector<32x2x256xf32>
    %22 = tpu.matmul %21, %20, %cst_12 {dimension_numbers = #tpu.dot_dimension_numbers<[2], [1], [1], [2], [0, 0, 0, 1, 1, 2], [0], [0]>} : vector<32x2x32xbf16>, vector<32x32x256xbf16>, vector<32x2x256xf32> -> vector<32x2x256xf32>
    "tpu.trace_stop"() : () -> ()
    %cst_13 = arith.constant dense<0.000000e+00> : vector<2x256xf32>
    %23 = vector.multi_reduction <add>, %22, %cst_13 [0] : vector<32x2x256xf32> to vector<2x256xf32>
    %24 = vector.broadcast %6 : vector<1x256xf32> to vector<2x256xf32>
    %25 = arith.addf %23, %24 : vector<2x256xf32>
    %cst_14 = arith.constant 0.000000e+00 : f32
    %26 = vector.broadcast %cst_14 : f32 to vector<2x256xf32>
    %27 = arith.maximumf %25, %26 : vector<2x256xf32>
    %c0_15 = arith.constant 0 : index
    %c0_16 = arith.constant 0 : index
    %28 = vector.load %arg3[%c0_15, %c0_16] : memref<2x256xf32, #tpu.memory_space<vmem>>, vector<2x256xf32>
    tpu.vector_store %arg3[%c0_15, %c0_16], %27 {strides = array<i32>} : memref<2x256xf32, #tpu.memory_space<vmem>>, vector<2x256xf32>,
    return
  }
}

</mosaic_0001>

<bundles_post_ra>
// kernel: tpu_custom_call.1
= control target key start
LH: loop header
LB: loop body
LE: loop exit
PB: predicated region body
PF: predicated region fallthrough
CT: control target
= control target key end

     0   :  { %8 = vsyncpa [#allocation3], 0  ;;  %s4912_s0 = inlined_call_operand.hbm [shape: bf16[64,1024], index: 0, kind: input, shape index: {}]   ;;  %s4913_s1 = inlined_call_operand.hbm [shape: bf16[2176,256], index: 1, kind: input, shape index: {}]   ;;  %s4914_s2 = inlined_call_operand.hbm [shape: f32[3,256], index: 2, kind: input, shape index: {}]   ;;  %s4915_s3 = inlined_call_operand.hbm [shape: f32[2,256], index: 3, kind: output, shape index: {}]  }
   0x1   :  { %9 = vsyncpa [#allocation6], 0 }
   0x2   :  { %10 = vsyncpa [#allocation4], 0  ;;  %s4581_s12 = smov [#allocation5]   ;;  %s4487_s16 = scalar_lea.hbm %s4913_s1, 34816 }
   0x3   :  { %s28_s13 = sshll.u32 %s4581_s12, 4  ;;  %p4488_p0 = scmp.ne.s32.totalorder %s4913_s1, %s4487_s16  ;;  %s29_s13 = int_to_ptr.vmem [resolvable:$true] %s28_s13 }
   0x4   :  { %p4491_p1 = scmp.lt.u32.totalorder %s4487_s16, %s4913_s1 }
   0x6   :  { %p4493_p2 = pnand %p4491_p1, %p4488_p0 }
   0x8   :  { %4496 = shalt.err (!%p4493_p2)
}
   0x9   :  { %s4497_s21 = scalar_lea.vmem %s29_s13, 34816  ;;  %p4502_p4 = scmp.lt.s32.totalorder %s29_s13, %s29_s13 }
   0xa   :  { %p4498_p3 = scmp.ne.s32.totalorder %s29_s13, %s4497_s21  ;;  %p4503_p5 = scmp.lt.s32.totalorder %s4497_s21, %s4497_s21 }
   0xc   :  { %p4504_p6 = por %p4503_p5, %p4502_p4 }
   0xe   :  { %p4505_p7 = pnand %p4504_p6, %p4498_p3 }
  0x10   :  { %4508 = shalt.err (!%p4505_p7)
}
  0x11   :  { %s4582_s22 = smov 128   ;;  %s4583_s23 = smov 8  }
  0x12   :  { %34 = dma.hbm_to_vmem [thread:$0]  %s4913_s1, 34816, %s29_s13, [#allocation6], %s4582_s22, %s4582_s22, %s4583_s23  }
  0x13   :  { %s4584_s26 = smov [#allocation2]   ;;  %s4509_s30 = scalar_lea.hbm %s4912_s0, 4096 }
  0x14   :  { %s16_s27 = sshll.u32 %s4584_s26, 4  ;;  %p4510_p8 = scmp.ne.s32.totalorder %s4912_s0, %s4509_s30  ;;  %s17_s27 = int_to_ptr.vmem [resolvable:$true] %s16_s27 }
  0x15   :  { %p4513_p9 = scmp.lt.u32.totalorder %s4509_s30, %s4912_s0 }
  0x17   :  { %p4515_p10 = pnand %p4513_p9, %p4510_p8 }
  0x19   :  { %4518 = shalt.err (!%p4515_p10)
}
  0x1a   :  { %s4519_s8 = scalar_lea.vmem %s17_s27, 4096  ;;  %p4524_p12 = scmp.lt.s32.totalorder %s17_s27, %s17_s27 }
  0x1b   :  { %p4520_p11 = scmp.ne.s32.totalorder %s17_s27, %s4519_s8  ;;  %p4525_p13 = scmp.lt.s32.totalorder %s4519_s8, %s4519_s8 }
  0x1d   :  { %p4526_p0 = por %p4525_p13, %p4524_p12 }
  0x1f   :  { %p4527_p1 = pnand %p4526_p0, %p4520_p11 }
  0x21   :  { %4530 = shalt.err (!%p4527_p1)
}
  0x22   :  { %s4585_s1 = smov 512   ;;  %s4586_s9 = smov 32  }
  0x23   :  { %22 = dma.hbm_to_vmem [thread:$0]  %s4912_s0, 4096, %s17_s27, [#allocation3], %s4585_s1, %s4585_s1, %s4586_s9  }
  0x24   :  { %s4587_s12 = smov [#allocation7]   ;;  %s4531_s16 = scalar_lea.hbm %s4914_s2, 128 }
  0x25   :  { %s41_s13 = sshll.u32 %s4587_s12, 4  ;;  %p4532_p2 = scmp.ne.s32.totalorder %s4914_s2, %s4531_s16  ;;  %s42_s13 = int_to_ptr.vmem [resolvable:$true] %s41_s13 }
  0x26   :  { %p4535_p3 = scmp.lt.u32.totalorder %s4531_s16, %s4914_s2 }
  0x28   :  { %p4537_p4 = pnand %p4535_p3, %p4532_p2 }
  0x2a   :  { %4540 = shalt.err (!%p4537_p4)
}
  0x2b   :  { %s4541_s21 = scalar_lea.vmem %s42_s13, 128  ;;  %p4546_p6 = scmp.lt.s32.totalorder %s42_s13, %s42_s13 }
  0x2c   :  { %p4542_p5 = scmp.ne.s32.totalorder %s42_s13, %s4541_s21  ;;  %p4547_p7 = scmp.lt.s32.totalorder %s4541_s21, %s4541_s21 }
  0x2e   :  { %p4548_p8 = por %p4547_p7, %p4546_p6 }
  0x30   :  { %p4549_p9 = pnand %p4548_p8, %p4542_p5 }
  0x32   :  { %4552 = shalt.err (!%p4549_p9)
}
  0x33   :  { %44 = dma.hbm_to_vmem [thread:$0]  %s4914_s2, 128, %s42_s13, [#allocation6]  }
  0x34   :  { %4575 = dma.done.wait [#allocation3], 4096  }
  0x35   :  { %4576 = vsyncadd [#allocation3], 4294963200 }
  0x36   :  { %4577 = dma.done.wait [#allocation6], 34944  }
  0x37   :  { %4578 = vsyncadd [#allocation6], 4294932352  ;;  %v4223_v0 = vld [vmem:[#allocation5 + $0x80] ss:$8 sps:$4 sm:$0xff]   ;;  %v4227_v4 = vld [vmem:[#allocation5 + $0x90] ss:$8 sps:$4 sm:$0xff]  }
  0x38   :  { %v4224_v1 = vld [vmem:[#allocation5 + $0x180] ss:$8 sps:$4 sm:$0xff]   ;;  %4016 = vmatprep.subr.bf16.mxu0 %v4223_v0  ;;  %v4228_v5 = vld [vmem:[#allocation5 + $0x190] ss:$8 sps:$4 sm:$0xff]   ;;  %vm1550_vm0 = vcmask 261120   ;;  %vm3579_vm1 = vcmask 1041408  }
  0x39   :  { %v4225_v2 = vld [vmem:[#allocation5] ss:$8 sps:$4 sm:$0xff]   ;;  %4056 = vmatprep.subr.bf16.mxu1 %v4224_v1  ;;  %v4229_v6 = vld [vmem:[#allocation5 + $0x10] ss:$8 sps:$4 sm:$0xff]   ;;  %s4591_s2 = smov [#allocation8]  }
  0x3a   :  { %v4226_v3 = vld [vmem:[#allocation5 + $0x100] ss:$8 sps:$4 sm:$0xff]   ;;  %4017 = vmatpush3.bf16.msra.mxu0 %v4225_v2  ;;  %v4230_v7 = vld [vmem:[#allocation5 + $0x110] ss:$8 sps:$4 sm:$0xff]   ;;  %s3739_s23 = sshll.u32 %s4591_s2, 4  ;;  %s3740_s23 = int_to_ptr.vmem [resolvable:$true] %s3739_s23 }
  0x3b   :  { %4057 = vmatpush3.bf16.msra.mxu1 %v4226_v3  ;;  %4018 = vmatprep.subr.bf16.mxu0 %v4227_v4  ;;  %v4231_v8 = vld [vmem:[#allocation5 + $0xa0] ss:$8 sps:$4 sm:$0xff]   ;;  %v4235_v12 = vld [vmem:[#allocation5 + $0xb0] ss:$8 sps:$4 sm:$0xff]   ;;  %s4553_s24 = scalar_lea.vmem %s3740_s23, 64  ;;  %p4558_p11 = scmp.lt.s32.totalorder %s3740_s23, %s3740_s23 }
  0x3c   :  { %4058 = vmatprep.subr.bf16.mxu1 %v4228_v5  ;;  %v4232_v9 = vld [vmem:[#allocation5 + $0x1a0] ss:$8 sps:$4 sm:$0xff]   ;;  %v4236_v13 = vld [vmem:[#allocation5 + $0x1b0] ss:$8 sps:$4 sm:$0xff]   ;;  %p4554_p10 = scmp.ne.s32.totalorder %s3740_s23, %s4553_s24  ;;  %p4559_p12 = scmp.lt.s32.totalorder %s4553_s24, %s4553_s24 }
  0x3d   :  { %v4233_v10 = vld [vmem:[#allocation5 + $0x20] ss:$8 sps:$4 sm:$0xff]   ;;  %v4237_v14 = vld [vmem:[#allocation5 + $0x30] ss:$8 sps:$4 sm:$0xff]  }
  0x3e   :  { %4019 = vmatpush3.bf16.msra.mxu0 %v4229_v6  ;;  %v4234_v11 = vld [vmem:[#allocation5 + $0x120] ss:$8 sps:$4 sm:$0xff]   ;;  %v4238_v15 = vld [vmem:[#allocation5 + $0x130] ss:$8 sps:$4 sm:$0xff]   ;;  %p4560_p13 = por %p4559_p12, %p4558_p11 }
  0x3f   :  { %4059 = vmatpush3.bf16.msra.mxu1 %v4230_v7  ;;  %4020 = vmatprep.subr.bf16.mxu0 %v4231_v8  ;;  %v4239_v16 = vld [vmem:[#allocation5 + $0xc0] ss:$8 sps:$4 sm:$0xff]   ;;  %v4243_v20 = vld [vmem:[#allocation5 + $0xd0] ss:$8 sps:$4 sm:$0xff]  }
  0x40   :  { %4060 = vmatprep.subr.bf16.mxu1 %v4232_v9  ;;  %v4240_v17 = vld [vmem:[#allocation5 + $0x1c0] ss:$8 sps:$4 sm:$0xff]   ;;  %v4244_v21 = vld [vmem:[#allocation5 + $0x1d0] ss:$8 sps:$4 sm:$0xff]   ;;  %p4561_p0 = pnand %p4560_p13, %p4554_p10 }
  0x41   :  { %v4241_v18 = vld [vmem:[#allocation5 + $0x40] ss:$8 sps:$4 sm:$0xff]   ;;  %v4245_v22 = vld [vmem:[#allocation5 + $0x50] ss:$8 sps:$4 sm:$0xff]  }
  0x42   :  { %4021 = vmatpush3.bf16.msra.mxu0 %v4233_v10  ;;  %v4242_v19 = vld [vmem:[#allocation5 + $0x140] ss:$8 sps:$4 sm:$0xff]   ;;  %v4246_v23 = vld [vmem:[#allocation5 + $0x150] ss:$8 sps:$4 sm:$0xff]  }
  0x43   :  { %4061 = vmatpush3.bf16.msra.mxu1 %v4234_v11  ;;  %4022 = vmatprep.subr.bf16.mxu0 %v4235_v12  ;;  %v4247_v24 = vld [vmem:[#allocation5 + $0xe0] ss:$8 sps:$4 sm:$0xff]   ;;  %v4251_v28 = vld [vmem:[#allocation5 + $0xf0] ss:$8 sps:$4 sm:$0xff]  }
  0x44   :  { %4062 = vmatprep.subr.bf16.mxu1 %v4236_v13  ;;  %v4248_v25 = vld [vmem:[#allocation5 + $0x1e0] ss:$8 sps:$4 sm:$0xff]   ;;  %v4252_v29 = vld [vmem:[#allocation5 + $0x1f0] ss:$8 sps:$4 sm:$0xff]  }
  0x45   :  { %v4249_v26 = vld [vmem:[#allocation5 + $0x60] ss:$8 sps:$4 sm:$0xff]   ;;  %v4253_v30 = vld [vmem:[#allocation5 + $0x70] ss:$8 sps:$4 sm:$0xff]  }
  0x46   :  { %4023 = vmatpush3.bf16.msra.mxu0 %v4237_v14  ;;  %v4250_v27 = vld [vmem:[#allocation5 + $0x160] ss:$8 sps:$4 sm:$0xff]   ;;  %v4254_v31 = vld [vmem:[#allocation5 + $0x170] ss:$8 sps:$4 sm:$0xff]  }
  0x47   :  { %4063 = vmatpush3.bf16.msra.mxu1 %v4238_v15  ;;  %4024 = vmatprep.subr.bf16.mxu0 %v4239_v16  ;;  %v55_v32 = vld [vmem:[#allocation2] sm:$0xff]  ;;  %v56_v34 = vld [vmem:[#allocation2 + $0x8] sm:$0xff]  ;;  %v4259_v44 = vld [vmem:[#allocation5 + $0x290] ss:$8 sps:$4 sm:$0xff]  }
  0x48   :  { %4064 = vmatprep.subr.bf16.mxu1 %v4240_v17  ;;  %v59_v33 = vld [vmem:[#allocation2 + $0x20] sm:$0xff]  ;;  %v60_v37 = vld [vmem:[#allocation2 + $0x28] sm:$0xff]  ;;  %v4260_v45 = vld [vmem:[#allocation5 + $0x390] ss:$8 sps:$4 sm:$0xff]  }
  0x49   :  { %v3750_v35 = vcombine.low %v55_v32, %v59_v33  ;;  %v3751_v36 = vcombine.high %v55_v32, %v59_v33  ;;  %v3752_v38 = vcombine.low %v56_v34, %v60_v37  ;;  %v3753_v39 = vcombine.high %v56_v34, %v60_v37  ;;  %v4255_v40 = vld [vmem:[#allocation5 + $0x280] ss:$8 sps:$4 sm:$0xff]   ;;  %v4261_v46 = vld [vmem:[#allocation5 + $0x210] ss:$8 sps:$4 sm:$0xff]  }
  0x4a   :  { %4025 = vmatpush3.bf16.msra.mxu0 %v4241_v18  ;;  %v4256_v41 = vld [vmem:[#allocation5 + $0x380] ss:$8 sps:$4 sm:$0xff]   ;;  %v4262_v47 = vld [vmem:[#allocation5 + $0x310] ss:$8 sps:$4 sm:$0xff]  }
  0x4b   :  { %4065 = vmatpush3.bf16.msra.mxu1 %v4242_v19  ;;  %4026 = vmatprep.subr.bf16.mxu0 %v4243_v20  ;;  %v4257_v42 = vld [vmem:[#allocation5 + $0x200] ss:$8 sps:$4 sm:$0xff]   ;;  %v4267_v60 = vld [vmem:[#allocation5 + $0x2b0] ss:$8 sps:$4 sm:$0xff]  }
  0x4c   :  { %4066 = vmatprep.subr.bf16.mxu1 %v4244_v21  ;;  %943 = vmatprep.mubr.bf16.mxu0 %v3751_v36  ;;  %v4258_v43 = vld [vmem:[#allocation5 + $0x300] ss:$8 sps:$4 sm:$0xff]   ;;  %v4268_v61 = vld [vmem:[#allocation5 + $0x3b0] ss:$8 sps:$4 sm:$0xff]  }
  0x4d   :  { %1008 = vmatprep.mubr.bf16.mxu1 %v3753_v39  ;;  %v63_v48 = vld [vmem:[#allocation2 + $0x40] sm:$0xff]  ;;  %v64_v51 = vld [vmem:[#allocation2 + $0x48] sm:$0xff]  ;;  %v4269_v62 = vld [vmem:[#allocation5 + $0x230] ss:$8 sps:$4 sm:$0xff]  }
  0x4e   :  { %4027 = vmatpush3.bf16.msra.mxu0 %v4245_v22  ;;  %v67_v49 = vld [vmem:[#allocation2 + $0x60] sm:$0xff]  ;;  %v68_v52 = vld [vmem:[#allocation2 + $0x68] sm:$0xff]  ;;  %v4270_v63 = vld [vmem:[#allocation5 + $0x330] ss:$8 sps:$4 sm:$0xff]  }
  0x4f   :  { %4067 = vmatpush3.bf16.msra.mxu1 %v4246_v23  ;;  %4028 = vmatprep.subr.bf16.mxu0 %v4247_v24  ;;  %v3759_v50 = vcombine.high %v63_v48, %v67_v49  ;;  %v3758_v53 = vcombine.low %v63_v48, %v67_v49  ;;  %v3761_v54 = vcombine.high %v64_v51, %v68_v52  ;;  %v4263_v56 = vld [vmem:[#allocation5 + $0x2a0] ss:$8 sps:$4 sm:$0xff]   ;;  %v4275_v12 = vld [vmem:[#allocation5 + $0x2d0] ss:$8 sps:$4 sm:$0xff]  }
  0x50   :  { %4068 = vmatprep.subr.bf16.mxu1 %v4248_v25  ;;  %v3760_v55 = vcombine.low %v64_v51, %v68_v52  ;;  %v4264_v57 = vld [vmem:[#allocation5 + $0x3a0] ss:$8 sps:$4 sm:$0xff]   ;;  %v4276_v13 = vld [vmem:[#allocation5 + $0x3d0] ss:$8 sps:$4 sm:$0xff]  }
  0x51   :  { %v4265_v58 = vld [vmem:[#allocation5 + $0x220] ss:$8 sps:$4 sm:$0xff]   ;;  %v4277_v14 = vld [vmem:[#allocation5 + $0x250] ss:$8 sps:$4 sm:$0xff]  }
  0x52   :  { %4029 = vmatpush3.bf16.msra.mxu0 %v4249_v26  ;;  %v4266_v59 = vld [vmem:[#allocation5 + $0x320] ss:$8 sps:$4 sm:$0xff]   ;;  %v4278_v15 = vld [vmem:[#allocation5 + $0x350] ss:$8 sps:$4 sm:$0xff]  }
  0x53   :  { %4069 = vmatpush3.bf16.msra.mxu1 %v4250_v27  ;;  %4030 = vmatprep.subr.bf16.mxu0 %v4251_v28  ;;  %v71_v0 = vld [vmem:[#allocation2 + $0x80] sm:$0xff]  ;;  %v72_v2 = vld [vmem:[#allocation2 + $0x88] sm:$0xff]  ;;  %v4283_v28 = vld [vmem:[#allocation5 + $0x2f0] ss:$8 sps:$4 sm:$0xff]  }
  0x54   :  { %4070 = vmatprep.subr.bf16.mxu1 %v4252_v29  ;;  %v75_v1 = vld [vmem:[#allocation2 + $0xa0] sm:$0xff]  ;;  %v76_v3 = vld [vmem:[#allocation2 + $0xa8] sm:$0xff]  ;;  %v4284_v29 = vld [vmem:[#allocation5 + $0x3f0] ss:$8 sps:$4 sm:$0xff]  }
  0x55   :  { %v3767_v4 = vcombine.high %v71_v0, %v75_v1  ;;  %v3769_v5 = vcombine.high %v72_v2, %v76_v3  ;;  %v3766_v6 = vcombine.low %v71_v0, %v75_v1  ;;  %v3768_v7 = vcombine.low %v72_v2, %v76_v3  ;;  %v4271_v8 = vld [vmem:[#allocation5 + $0x2c0] ss:$8 sps:$4 sm:$0xff]   ;;  %v57_v32 = vld [vmem:[#allocation2 + $0x10] sm:$0xff]  ;;  %v58_v36 = vld [vmem:[#allocation2 + $0x18] sm:$0xff] }
  0x56   :  { %4031 = vmatpush3.bf16.msra.mxu0 %v4253_v30  ;;  %v4272_v9 = vld [vmem:[#allocation5 + $0x3c0] ss:$8 sps:$4 sm:$0xff]   ;;  %v4285_v30 = vld [vmem:[#allocation5 + $0x270] ss:$8 sps:$4 sm:$0xff]  }
  0x57   :  { %4071 = vmatpush3.bf16.msra.mxu1 %v4254_v31  ;;  %4096 = vmatprep.subr.bf16.mxu0 %v4255_v40  ;;  %v4273_v10 = vld [vmem:[#allocation5 + $0x240] ss:$8 sps:$4 sm:$0xff]   ;;  %v4286_v31 = vld [vmem:[#allocation5 + $0x370] ss:$8 sps:$4 sm:$0xff]  }
  0x58   :  { %4136 = vmatprep.subr.bf16.mxu1 %v4256_v41  ;;  %v4274_v11 = vld [vmem:[#allocation5 + $0x340] ss:$8 sps:$4 sm:$0xff]   ;;  %v61_v33 = vld [vmem:[#allocation2 + $0x30] sm:$0xff]  ;;  %v62_v37 = vld [vmem:[#allocation2 + $0x38] sm:$0xff] }
  0x59   :  { %944 = vmatmul.mubr.bf16.vlgmr.msra.gmra.mrb[0].mxu0 %v3750_v35  ;;  %v79_v16 = vld [vmem:[#allocation2 + $0xc0] sm:$0xff]  ;;  %v80_v18 = vld [vmem:[#allocation2 + $0xc8] sm:$0xff]  ;;  %v3754_v34 = vcombine.low %v57_v32, %v61_v33  ;;  %v3755_v35 = vcombine.high %v57_v32, %v61_v33  ;;  %v3756_v39 = vcombine.low %v58_v36, %v62_v37  ;;  %v3757_v40 = vcombine.high %v58_v36, %v62_v37  ;;  %v69_v41 = vld [vmem:[#allocation2 + $0x70] sm:$0xff] }
  0x5a   :  { %1009 = vmatmul.mubr.bf16.vlgmr.msra.gmra.mrb[0].mxu1 %v3752_v38  ;;  %4097 = vmatpush3.bf16.msra.mxu0 %v4257_v42  ;;  %v83_v17 = vld [vmem:[#allocation2 + $0xe0] sm:$0xff]  ;;  %v84_v20 = vld [vmem:[#allocation2 + $0xe8] sm:$0xff]  ;;  %v65_v38 = vld [vmem:[#allocation2 + $0x50] sm:$0xff] }
  0x5b   :  { %4137 = vmatpush3.bf16.msra.mxu1 %v4258_v43  ;;  %4098 = vmatprep.subr.bf16.mxu0 %v4259_v44  ;;  %v3775_v19 = vcombine.high %v79_v16, %v83_v17  ;;  %v3774_v21 = vcombine.low %v79_v16, %v83_v17  ;;  %v3777_v22 = vcombine.high %v80_v18, %v84_v20  ;;  %v4279_v24 = vld [vmem:[#allocation5 + $0x2e0] ss:$8 sps:$4 sm:$0xff]   ;;  %v66_v42 = vld [vmem:[#allocation2 + $0x58] sm:$0xff] }
  0x5c   :  { %4138 = vmatprep.subr.bf16.mxu1 %v4260_v45  ;;  %951 = vmatprep.mubr.bf16.mxu0 %v3759_v50  ;;  %v3776_v23 = vcombine.low %v80_v18, %v84_v20  ;;  %v4280_v25 = vld [vmem:[#allocation5 + $0x3e0] ss:$8 sps:$4 sm:$0xff]   ;;  %v70_v43 = vld [vmem:[#allocation2 + $0x78] sm:$0xff]  ;;  %v3763_v44 = vcombine.high %v65_v38, %v69_v41  ;;  %v3762_v50 = vcombine.low %v65_v38, %v69_v41 }
  0x5d   :  { %1016 = vmatprep.mubr.bf16.mxu1 %v3761_v54  ;;  %v4281_v26 = vld [vmem:[#allocation5 + $0x260] ss:$8 sps:$4 sm:$0xff]   ;;  %v3765_v45 = vcombine.high %v66_v42, %v70_v43  ;;  %v74_v48 = vld [vmem:[#allocation2 + $0x98] sm:$0xff]  ;;  %v3764_v51 = vcombine.low %v66_v42, %v70_v43  ;;  %v81_v54 = vld [vmem:[#allocation2 + $0xd0] sm:$0xff] }
  0x5e   :  { %4099 = vmatpush3.bf16.msra.mxu0 %v4261_v46  ;;  %v4282_v27 = vld [vmem:[#allocation5 + $0x360] ss:$8 sps:$4 sm:$0xff]   ;;  %v73_v46 = vld [vmem:[#allocation2 + $0x90] sm:$0xff]  ;;  %v78_v49 = vld [vmem:[#allocation2 + $0xb8] sm:$0xff] }
  0x5f   :  { %4139 = vmatpush3.bf16.msra.mxu1 %v4262_v47  ;;  %4100 = vmatprep.subr.bf16.mxu0 %v4263_v56  ;;  %v77_v47 = vld [vmem:[#allocation2 + $0xb0] sm:$0xff]  ;;  %v82_v56 = vld [vmem:[#allocation2 + $0xd8] sm:$0xff]  ;;  %v4287_v0 = vld [vmem:[#allocation5 + $0x400] ss:$8 sps:$4 sm:$0xff]  }
  0x60   :  { %4140 = vmatprep.subr.bf16.mxu1 %v4264_v57  ;;  %v3771_v52 = vcombine.high %v73_v46, %v77_v47  ;;  %v86_v57 = vld [vmem:[#allocation2 + $0xf8] sm:$0xff]  ;;  %v4289_v2 = vld [vmem:[#allocation5 + $0x420] ss:$8 sps:$4 sm:$0xff]  }
  0x61   :  { %952 = vmatmul.mubr.bf16.gmra.mrb[4].mxu0 %v3758_v53  ;;  %v3773_v53 = vcombine.high %v74_v48, %v78_v49  ;;  %v4288_v1 = vld [vmem:[#allocation5 + $0x410] ss:$8 sps:$4 sm:$0xff]  }
  0x62   :  { %1017 = vmatmul.mubr.bf16.gmra.mrb[4].mxu1 %v3760_v55  ;;  %4101 = vmatpush3.bf16.msra.mxu0 %v4265_v58  ;;  %v85_v55 = vld [vmem:[#allocation2 + $0xf0] sm:$0xff]  ;;  %v3770_v58 = vcombine.low %v73_v46, %v77_v47 }
  0x63   :  { %4141 = vmatpush3.bf16.msra.mxu1 %v4266_v59  ;;  %4102 = vmatprep.subr.bf16.mxu0 %v4267_v60  ;;  %v3772_v59 = vcombine.low %v74_v48, %v78_v49  ;;  %v3779_v60 = vcombine.high %v81_v54, %v85_v55  ;;  %v4290_v3 = vld [vmem:[#allocation5 + $0x430] ss:$8 sps:$4 sm:$0xff]  }
  0x64   :  { %4142 = vmatprep.subr.bf16.mxu1 %v4268_v61  ;;  %959 = vmatprep.mubr.bf16.mxu0 %v3767_v4  ;;  %v3781_v61 = vcombine.high %v82_v56, %v86_v57  ;;  %v4291_v4 = vld [vmem:[#allocation5 + $0x440] ss:$8 sps:$4 sm:$0xff]  }
  0x65   :  { %1024 = vmatprep.mubr.bf16.mxu1 %v3769_v5  ;;  %v4292_v5 = vld [vmem:[#allocation5 + $0x450] ss:$8 sps:$4 sm:$0xff]  }
  0x66   :  { %4103 = vmatpush3.bf16.msra.mxu0 %v4269_v62  ;;  %v3778_v62 = vcombine.low %v81_v54, %v85_v55 }
  0x67   :  { %4143 = vmatpush3.bf16.msra.mxu1 %v4270_v63  ;;  %4104 = vmatprep.subr.bf16.mxu0 %v4271_v8  ;;  %v3780_v63 = vcombine.low %v82_v56, %v86_v57 }
  0x68   :  { %4144 = vmatprep.subr.bf16.mxu1 %v4272_v9 }
  0x69   :  { %960 = vmatmul.mubr.bf16.gmra.mrb[8].mxu0 %v3766_v6  ;;  %v4293_v6 = vld [vmem:[#allocation5 + $0x460] ss:$8 sps:$4 sm:$0xff]  }
  0x6a   :  { %1025 = vmatmul.mubr.bf16.gmra.mrb[8].mxu1 %v3768_v7  ;;  %4105 = vmatpush3.bf16.msra.mxu0 %v4273_v10  ;;  %v4294_v7 = vld [vmem:[#allocation5 + $0x470] ss:$8 sps:$4 sm:$0xff]   ;;  %v3749_v10 = vld [vmem:[#allocation7] ss:$0 sm:$0xff] }
  0x6b   :  { %4145 = vmatpush3.bf16.msra.mxu1 %v4274_v11  ;;  %4106 = vmatprep.subr.bf16.mxu0 %v4275_v12 }
  0x6c   :  { %4146 = vmatprep.subr.bf16.mxu1 %v4276_v13  ;;  %967 = vmatprep.mubr.bf16.mxu0 %v3775_v19 }
  0x6d   :  { %1032 = vmatprep.mubr.bf16.mxu1 %v3777_v22 }
  0x6e   :  { %4107 = vmatpush3.bf16.msra.mxu0 %v4277_v14 }
  0x6f   :  { %4147 = vmatpush3.bf16.msra.mxu1 %v4278_v15  ;;  %4108 = vmatprep.subr.bf16.mxu0 %v4279_v24 }
  0x70   :  { %4148 = vmatprep.subr.bf16.mxu1 %v4280_v25 }
  0x71   :  { %968 = vmatmul.mubr.bf16.gmra.mrb[12].mxu0 %v3774_v21 }
  0x72   :  { %1033 = vmatmul.mubr.bf16.gmra.mrb[12].mxu1 %v3776_v23  ;;  %4109 = vmatpush3.bf16.msra.mxu0 %v4281_v26 }
  0x73   :  { %4149 = vmatpush3.bf16.msra.mxu1 %v4282_v27  ;;  %4110 = vmatprep.subr.bf16.mxu0 %v4283_v28 }
  0x74   :  { %4150 = vmatprep.subr.bf16.mxu1 %v4284_v29  ;;  %1073 = vmatprep.mubr.bf16.mxu0 %v3755_v35 }
  0x75   :  { %1138 = vmatprep.mubr.bf16.mxu1 %v3757_v40 }
  0x76   :  { %4111 = vmatpush3.bf16.msra.mxu0 %v4285_v30 }
  0x77   :  { %4151 = vmatpush3.bf16.msra.mxu1 %v4286_v31  ;;  %4188 = vmatprep.subr.bf16.mxu0 %v4287_v0 }
  0x79   :  { %1074 = vmatmul.mubr.bf16.vlgmr.msra.gmra.mrb[16].mxu0 %v3754_v34 }
  0x7a   :  { %1139 = vmatmul.mubr.bf16.vlgmr.msra.gmra.mrb[16].mxu1 %v3756_v39  ;;  %1081 = vmatprep.mubr.bf16.mxu0 %v3763_v44 }
  0x7b   :  { %1146 = vmatprep.mubr.bf16.mxu1 %v3765_v45  ;;  %4189 = vmatpush3.bf16.msra.mxu0 %v4287_v0 }
  0x7c   :  { %4190 = vmatprep.subr.bf16.mxu0 %v4288_v1 }
  0x7f   :  { %4191 = vmatpush3.bf16.msra.mxu0 %v4288_v1 }
  0x80   :  { %4192 = vmatprep.subr.bf16.mxu0 %v4289_v2 }
  0x81   :  { %1082 = vmatmul.mubr.bf16.gmra.mrb[20].mxu0 %v3762_v50 }
  0x82   :  { %1147 = vmatmul.mubr.bf16.gmra.mrb[20].mxu1 %v3764_v51  ;;  %1089 = vmatprep.mubr.bf16.mxu0 %v3771_v52 }
  0x83   :  { %1154 = vmatprep.mubr.bf16.mxu1 %v3773_v53  ;;  %4193 = vmatpush3.bf16.msra.mxu0 %v4289_v2 }
  0x84   :  { %4194 = vmatprep.subr.bf16.mxu0 %v4290_v3 }
  0x87   :  { %4195 = vmatpush3.bf16.msra.mxu0 %v4290_v3 }
  0x88   :  { %4196 = vmatprep.subr.bf16.mxu0 %v4291_v4 }
  0x89   :  { %1090 = vmatmul.mubr.bf16.gmra.mrb[24].mxu0 %v3770_v58 }
  0x8a   :  { %1155 = vmatmul.mubr.bf16.gmra.mrb[24].mxu1 %v3772_v59  ;;  %1097 = vmatprep.mubr.bf16.mxu0 %v3779_v60 }
  0x8b   :  { %1162 = vmatprep.mubr.bf16.mxu1 %v3781_v61  ;;  %4197 = vmatpush3.bf16.msra.mxu0 %v4291_v4 }
  0x8c   :  { %4198 = vmatprep.subr.bf16.mxu0 %v4292_v5 }
  0x8f   :  { %4199 = vmatpush3.bf16.msra.mxu0 %v4292_v5 }
  0x90   :  { %4200 = vmatprep.subr.bf16.mxu0 %v4293_v6 }
  0x91   :  { %1098 = vmatmul.mubr.bf16.gmra.mrb[28].mxu0 %v3778_v62 }
  0x92   :  { %1163 = vmatmul.mubr.bf16.gmra.mrb[28].mxu1 %v3780_v63 }
  0x93   :  { %4201 = vmatpush3.bf16.msra.mxu0 %v4293_v6 }
  0x94   :  { %4202 = vmatprep.subr.bf16.mxu0 %v4294_v7 }
  0x97   :  { %4203 = vmatpush3.bf16.msra.mxu0 %v4294_v7 }
 0x12c   :  { %v4032_v8 = vpop.f32.mrb[0].mxu0 }
 0x12d   :  { %v4072_v9 = vpop.f32.mrb[0].mxu1  ;;  %v4033_v11 = vpop.f32.mrb[1].mxu0 }
 0x12e   :  { %v4034_v12 = vadd.f32 %v4033_v11, %v4032_v8  ;;  %v4073_v13 = vpop.f32.mrb[1].mxu1  ;;  %v4035_v14 = vpop.f32.mrb[2].mxu0 }
 0x12f   :  { %v4074_v15 = vadd.f32 %v4073_v13, %v4072_v9  ;;  %v4075_v16 = vpop.f32.mrb[2].mxu1  ;;  %v4036_v17 = vpop.f32.mrb[3].mxu0 }
 0x130   :  { %v946_v18 = vadd.f32 %v4034_v12, %v3749_v10  ;;  %v4037_v19 = vadd.f32 %v4036_v17, %v4035_v14  ;;  %v4076_v20 = vpop.f32.mrb[3].mxu1 }
 0x131   :  { %v4077_v21 = vadd.f32 %v4076_v20, %v4075_v16 }
 0x132   :  { %v1011_v22 = vadd.f32 %v4074_v15, %v946_v18  ;;  %v949_v23 = vadd.f32 %v4037_v19, %v3749_v10 }
 0x134   :  { %v4648_v24 = vadd.f32 %v4077_v21, %v949_v23  ;;  %v4038_v25 = vpop.f32.mrb[4].mxu0 }
 0x135   :  { %v4078_v26 = vpop.f32.mrb[4].mxu1  ;;  %v4039_v27 = vpop.f32.mrb[5].mxu0 }
 0x136   :  { %v4040_v28 = vadd.f32 %v4039_v27, %v4038_v25  ;;  %v4079_v29 = vpop.f32.mrb[5].mxu1  ;;  %v4041_v30 = vpop.f32.mrb[6].mxu0 }
 0x137   :  { %v4080_v31 = vadd.f32 %v4079_v29, %v4078_v26  ;;  %v4081_v32 = vpop.f32.mrb[6].mxu1  ;;  %v4042_v33 = vpop.f32.mrb[7].mxu0 }
 0x138   :  { %v954_v34 = vadd.f32 %v4040_v28, %v3749_v10  ;;  %v4043_v35 = vadd.f32 %v4042_v33, %v4041_v30  ;;  %v4082_v36 = vpop.f32.mrb[7].mxu1 }
 0x139   :  { %v4083_v37 = vadd.f32 %v4082_v36, %v4081_v32 }
 0x13a   :  { %v1019_v38 = vadd.f32 %v4080_v31, %v954_v34  ;;  %v957_v39 = vadd.f32 %v4043_v35, %v3749_v10 }
 0x13c   :  { %v4650_v40 = vadd.f32 %v4083_v37, %v957_v39  ;;  %v4044_v41 = vpop.f32.mrb[8].mxu0 }
 0x13d   :  { %v4084_v42 = vpop.f32.mrb[8].mxu1  ;;  %v4045_v43 = vpop.f32.mrb[9].mxu0 }
 0x13e   :  { %v4085_v44 = vpop.f32.mrb[9].mxu1  ;;  %v4046_v45 = vadd.f32 %v4045_v43, %v4044_v41  ;;  %v4047_v47 = vpop.f32.mrb[10].mxu0 }
 0x13f   :  { %v4086_v46 = vadd.f32 %v4085_v44, %v4084_v42  ;;  %v4087_v48 = vpop.f32.mrb[10].mxu1  ;;  %v4048_v49 = vpop.f32.mrb[11].mxu0 }
 0x140   :  { %v4088_v50 = vpop.f32.mrb[11].mxu1  ;;  %v962_v51 = vadd.f32 %v4046_v45, %v3749_v10  ;;  %v4049_v52 = vadd.f32 %v4048_v49, %v4047_v47 }
 0x141   :  { %v4089_v53 = vadd.f32 %v4088_v50, %v4087_v48 }
 0x142   :  { %v4652_v54 = vadd.f32 %v4086_v46, %v962_v51  ;;  %v965_v55 = vadd.f32 %v4049_v52, %v3749_v10 }
 0x144   :  { %v4654_v56 = vadd.f32 %v4089_v53, %v965_v55  ;;  %v4050_v57 = vpop.f32.mrb[12].mxu0 }
 0x145   :  { %v4090_v58 = vpop.f32.mrb[12].mxu1  ;;  %v4051_v59 = vpop.f32.mrb[13].mxu0 }
 0x146   :  { %v4052_v60 = vadd.f32 %v4051_v59, %v4050_v57  ;;  %v4091_v61 = vpop.f32.mrb[13].mxu1  ;;  %v4053_v62 = vpop.f32.mrb[14].mxu0 }
 0x147   :  { %v4092_v63 = vadd.f32 %v4091_v61, %v4090_v58  ;;  %v4093_v0 = vpop.f32.mrb[14].mxu1  ;;  %v4054_v1 = vpop.f32.mrb[15].mxu0 }
 0x148   :  { %v970_v2 = vadd.f32 %v4052_v60, %v3749_v10  ;;  %v4055_v3 = vadd.f32 %v4054_v1, %v4053_v62  ;;  %v4094_v4 = vpop.f32.mrb[15].mxu1 }
 0x149   :  { %v4095_v5 = vadd.f32 %v4094_v4, %v4093_v0 }
 0x14a   :  { %v4656_v6 = vadd.f32 %v4092_v63, %v970_v2  ;;  %v973_v7 = vadd.f32 %v4055_v3, %v3749_v10 }
 0x14c   :  { %v4658_v8 = vadd.f32 %v4095_v5, %v973_v7  ;;  %v4112_v9 = vpop.f32.mrb[16].mxu0 }
 0x14d   :  { %v4152_v11 = vpop.f32.mrb[16].mxu1  ;;  %v4113_v12 = vpop.f32.mrb[17].mxu0 }
 0x14e   :  { %v4114_v13 = vadd.f32 %v4113_v12, %v4112_v9  ;;  %v4153_v14 = vpop.f32.mrb[17].mxu1  ;;  %v4115_v15 = vpop.f32.mrb[18].mxu0 }
 0x14f   :  { %v4154_v16 = vadd.f32 %v4153_v14, %v4152_v11  ;;  %v4155_v17 = vpop.f32.mrb[18].mxu1  ;;  %v4116_v18 = vpop.f32.mrb[19].mxu0 }
 0x150   :  { %v1076_v19 = vadd.f32 %v4114_v13, %v1011_v22  ;;  %v4117_v20 = vadd.f32 %v4116_v18, %v4115_v15  ;;  %v4156_v21 = vpop.f32.mrb[19].mxu1 }
 0x151   :  { %v4157_v23 = vadd.f32 %v4156_v21, %v4155_v17 }
 0x152   :  { %v1141_v25 = vadd.f32 %v4154_v16, %v1076_v19  ;;  %v1079_v26 = vadd.f32 %v4117_v20, %v4648_v24 }
 0x154   :  { %v1144_v27 = vadd.f32 %v4157_v23, %v1079_v26  ;;  %v4118_v10 = vpop.f32.mrb[20].mxu0  ;;  %v1171_v30 = vmax.f32 %v1141_v25, 0.0  ;;  %v4295_v26 = vld [vmem:[#allocation5 + $0x480] ss:$8 sps:$4 sm:$0xff]  }
 0x155   :  { %v4158_v28 = vpop.f32.mrb[20].mxu1  ;;  %v4119_v29 = vpop.f32.mrb[21].mxu0 }
 0x156   :  { %v1172_v31 = vmax.f32 %v1144_v27, 0.0  ;;  %v4120_v32 = vadd.f32 %v4119_v29, %v4118_v10  ;;  %v4159_v33 = vpop.f32.mrb[21].mxu1  ;;  %v4121_v34 = vpop.f32.mrb[22].mxu0  ;;  %v4297_v27 = vld [vmem:[#allocation5 + $0x484] ss:$8 sps:$4 sm:$0xff]  }
 0x157   :  { %v4160_v35 = vadd.f32 %v4159_v33, %v4158_v28  ;;  %v4161_v36 = vpop.f32.mrb[22].mxu1  ;;  %v4122_v37 = vpop.f32.mrb[23].mxu0  ;;  %1554 = vmatprep.subr.bf16.mxu1 %v4297_v27  ;;  %v4298_v10 = vld [vmem:[#allocation5 + $0x490] ss:$8 sps:$4 sm:$0xff]   ;;  %v4300_v28 = vld [vmem:[#allocation5 + $0x494] ss:$8 sps:$4 sm:$0xff]  }
 0x158   :  { %v1084_v39 = vadd.f32 %v4120_v32, %v1019_v38  ;;  %v4123_v22 = vadd.f32 %v4122_v37, %v4121_v34  ;;  %v4162_v41 = vpop.f32.mrb[23].mxu1  ;;  %v1179_v42 = vpack.c.bf16 %v1172_v31, %v1171_v30  ;;  %1555 = vmatpush1.bf16.msra.mxu1 %v4295_v26  ;;  %v4301_v29 = vld [vmem:[#allocation5 + $0x4c0] ss:$8 sps:$4 sm:$0xff]   ;;  %v4306_v30 = vld [vmem:[#allocation5 + $0x4d4] ss:$8 sps:$4 sm:$0xff]  }
 0x159   :  { %v4163_v43 = vadd.f32 %v4162_v41, %v4161_v36  ;;  %1556 = vmatprep.subr.bf16.mxu1 %v4300_v28  ;;  %v4304_v31 = vld [vmem:[#allocation5 + $0x4d0] ss:$8 sps:$4 sm:$0xff]   ;;  %v4309_v32 = vld [vmem:[#allocation5 + $0x4a4] ss:$8 sps:$4 sm:$0xff]   ;;  %v3846_v34 = vld [vmem:[#allocation7 + $0x1] ss:$0 sm:$0xff] }
 0x15a   :  { %v1149_v44 = vadd.f32 %v4160_v35, %v1084_v39  ;;  %v1087_v24 = vadd.f32 %v4123_v22, %v4650_v40  ;;  %4204 = vmatprep.mubr.bf16.mxu0 %v1179_v42  ;;  %v4312_v33 = vld [vmem:[#allocation5 + $0x504] ss:$8 sps:$4 sm:$0xff]   ;;  %v4307_v27 = vld [vmem:[#allocation5 + $0x4a0] ss:$8 sps:$4 sm:$0xff]  }
 0x15c   :  { %v1152_v45 = vadd.f32 %v4163_v43, %v1087_v24  ;;  %v4124_v46 = vpop.f32.mrb[24].mxu0  ;;  %v1173_v49 = vmax.f32 %v1149_v44, 0.0  ;;  %1557 = vmatpush1.bf16.msra.mxu1 %v4298_v10 }
 0x15d   :  { %v4164_v47 = vpop.f32.mrb[24].mxu1  ;;  %v4125_v48 = vpop.f32.mrb[25].mxu0  ;;  %1618 = vmatprep.subr.bf16.mxu1 %v4309_v32 }
 0x15e   :  { %v1174_v50 = vmax.f32 %v1152_v45, 0.0  ;;  %v4126_v51 = vadd.f32 %v4125_v48, %v4124_v46  ;;  %v4165_v52 = vpop.f32.mrb[25].mxu1  ;;  %v4127_v53 = vpop.f32.mrb[26].mxu0 }
 0x15f   :  { %v4166_v55 = vadd.f32 %v4165_v52, %v4164_v47  ;;  %v4167_v57 = vpop.f32.mrb[26].mxu1  ;;  %v4128_v38 = vpop.f32.mrb[27].mxu0 }
 0x160   :  { %v1180_v58 = vpack.c.bf16 %v1174_v50, %v1173_v49  ;;  %v1092_v59 = vadd.f32 %v4126_v51, %v4652_v54  ;;  %v4129_v60 = vadd.f32 %v4128_v38, %v4127_v53  ;;  %v4168_v61 = vpop.f32.mrb[27].mxu1  ;;  %v4589_v49 = vmov 1983009808  }
 0x161   :  { %v4169_v62 = vadd.f32 %v4168_v61, %v4167_v57  ;;  %v1336_v50 = vunpack.c.l.s4 %v4589_v49  ;;  %v1338_v51 = vlaneseq }
 0x162   :  { %v1157_v40 = vadd.f32 %v4166_v55, %v1092_v59  ;;  %v1095_v63 = vadd.f32 %v4129_v60, %v4654_v56  ;;  %4205 = vmatmul.mubr.bf16.vlgmr.msra.gmra.mrb[32].mxu0 %v1180_v58  ;;  %v4590_v58 = vmov 1934713408  }
 0x163   :  { %v1351_v59 = vunpack.c.l.s4 %v4590_v58  ;;  %v1337_v61 = vunpack.c.0.s8 %v1336_v50  ;;  %v4328_v58 = vld [vmem:[#allocation5 + $0x550] ss:$8 sps:$4 sm:$0xff]  }
 0x164   :  { %v1160_v0 = vadd.f32 %v4169_v62, %v1095_v63  ;;  %v4130_v1 = vpop.f32.mrb[28].mxu0  ;;  %v1175_v4 = vmax.f32 %v1157_v40, 0.0  ;;  %v4668_v62 = vshrl.u32 %v1338_v51, 7  ;;  %v4322_v51 = vld [vmem:[#allocation5 + $0x540] ss:$8 sps:$4 sm:$0xff]  }
 0x165   :  { %v4170_v2 = vpop.f32.mrb[28].mxu1  ;;  %v4131_v3 = vpop.f32.mrb[29].mxu0 }
 0x166   :  { %v1176_v5 = vmax.f32 %v1160_v0, 0.0  ;;  %v4132_v7 = vadd.f32 %v4131_v3, %v4130_v1  ;;  %v4171_v9 = vpop.f32.mrb[29].mxu1  ;;  %v4133_v11 = vpop.f32.mrb[30].mxu0  ;;  %v1352_v3 = vunpack.c.0.s8 %v1351_v59  ;;  %v4331_v59 = vld [vmem:[#allocation5 + $0x520] ss:$8 sps:$4 sm:$0xff]  }
 0x167   :  { %v4172_v12 = vadd.f32 %v4171_v9, %v4170_v2  ;;  %v4173_v13 = vpop.f32.mrb[30].mxu1  ;;  %v4134_v14 = vpop.f32.mrb[31].mxu0  ;;  %v4675_v9 = vsub.s32 %v1337_v61, %v4668_v62 }
 0x168   :  { %v1100_v54 = vadd.f32 %v4132_v7, %v4656_v6  ;;  %v4135_v15 = vadd.f32 %v4134_v14, %v4133_v11  ;;  %v4174_v16 = vpop.f32.mrb[31].mxu1  ;;  %v1181_v17 = vpack.c.bf16 %v1176_v5, %v1175_v4  ;;  %v4588_v6 = vmov 0  }
 0x169   :  { %v4175_v18 = vadd.f32 %v4174_v16, %v4173_v13  ;;  %1586 = vmatprep.mubr.bf16.mxu1 %v4588_v6  ;;  %v4672_v7 = vpack.i.b16 %v4588_v6, %v4588_v6 }
 0x16a   :  { %v1165_v56 = vadd.f32 %v4172_v12, %v1100_v54  ;;  %v1103_v19 = vadd.f32 %v4135_v15, %v4658_v8  ;;  %4208 = vmatprep.mubr.bf16.mxu0 %v1181_v17  ;;  %v4303_v8 = vld [vmem:[#allocation5 + $0x4c4] ss:$8 sps:$4 sm:$0xff]   ;;  %v4678_v15 = vsub.s32 %v1352_v3, %v4668_v62  ;;  %v4342_v3 = vld [vmem:[#allocation5 + $0x594] ss:$8 sps:$4 sm:$0xff]  }
 0x16b   :  { %1682 = vmatprep.subr.bf16.mxu0 %v4303_v8  ;;  %v4315_v8 = vld [vmem:[#allocation5 + $0x4b4] ss:$8 sps:$4 sm:$0xff]  }
 0x16c   :  { %v1168_v20 = vadd.f32 %v4175_v18, %v1103_v19  ;;  %v1177_v21 = vmax.f32 %v1165_v56, 0.0  ;;  %1683 = vmatpush1.bf16.msra.mxu0 %v4301_v29 }
 0x16d   :  { %1684 = vmatprep.subr.bf16.mxu0 %v4306_v30 }
 0x16e   :  { %v1178_v23 = vmax.f32 %v1168_v20, 0.0 }
 0x170   :  { %v1182_v25 = vpack.c.bf16 %v1178_v23, %v1177_v21  ;;  %1685 = vmatpush1.bf16.msra.mxu0 %v4304_v31 }
 0x171   :  { %1810 = vmatprep.subr.bf16.mxu0 %v4312_v33  ;;  %v4310_v33 = vld [vmem:[#allocation5 + $0x500] ss:$8 sps:$4 sm:$0xff]  }
 0x172   :  { %4209 = vmatmul.mubr.bf16.gmra.mrb[36].mxu0 %v1182_v25 }
 0x173   :  { %1714 = vmatprep.mubr.bf16.mxu0 %v4588_v6 }
 0x235   :  { %v4206_v35 = vpop.f32.mrb[32].mxu0 }
 0x236   :  { %v1278_v36 = vadd.f32 %v4206_v35, %v3846_v34  ;;  %v1269_v37 = vpop.f32.mrb[33].mxu0  ;;  %v4313_v35 = vld [vmem:[#allocation5 + $0x4b0] ss:$8 sps:$4 sm:$0xff]  }
 0x237   :  { %v1270_v39 = vadd.f32 %v3846_v34, %v1269_v37  ;;  %v4207_v22 = vpop.f32.mrb[34].mxu0 }
 0x238   :  { %v1281_v41 = vadd.f32 %v4207_v22, %v3846_v34  ;;  %v1272_v42 = vpop.f32.mrb[35].mxu0  ;;  %v1302_v44 = vmax.f32 %v1278_v36, 0.0  ;;  %v4318_v36 = vld [vmem:[#allocation5 + $0x514] ss:$8 sps:$4 sm:$0xff]   ;;  %v4321_v22 = vld [vmem:[#allocation5 + $0x4e4] ss:$8 sps:$4 sm:$0xff]  }
 0x239   :  { %v1273_v43 = vadd.f32 %v3846_v34, %v1272_v42  ;;  %v1300_v45 = vmax.f32 %v1270_v39, 0.0 }
 0x23a   :  { %v1303_v24 = vmax.f32 %v1281_v41, 0.0 }
 0x23b   :  { %v1301_v46 = vmax.f32 %v1273_v43, 0.0  ;;  %v4316_v43 = vld [vmem:[#allocation5 + $0x510] ss:$8 sps:$4 sm:$0xff]  }
 0x23c   :  { %v1309_v47 = vpack.c.bf16 %v1303_v24, %v1302_v44  ;;  %v4319_v24 = vld [vmem:[#allocation5 + $0x4e0] ss:$8 sps:$4 sm:$0xff]  }
 0x23d   :  { %v1308_v48 = vpack.c.bf16 %v1301_v46, %v1300_v45  ;;  %v4324_v45 = vld [vmem:[#allocation5 + $0x544] ss:$8 sps:$4 sm:$0xff]  }
 0x23e   :  { %v1330_v12 = vshrl.u32 %v1309_v47, 16 }
 0x23f   :  { %v1316_v54 = vshrl.u32 %v1308_v48, 16 }
 0x245   :  { %v4210_v52 = vpop.f32.mrb[36].mxu0 }
 0x246   :  { %v1294_v53 = vadd.f32 %v4210_v52, %v3846_v34  ;;  %v1285_v55 = vpop.f32.mrb[37].mxu0 }
 0x247   :  { %v1286_v57 = vadd.f32 %v3846_v34, %v1285_v55  ;;  %v4211_v38 = vpop.f32.mrb[38].mxu0  ;;  %v4325_v55 = vld [vmem:[#allocation5 + $0x4f0] ss:$8 sps:$4 sm:$0xff]  }
 0x248   :  { %v1297_v60 = vadd.f32 %v4211_v38, %v3846_v34  ;;  %v1288_v40 = vpop.f32.mrb[39].mxu0  ;;  %v1306_v0 = vmax.f32 %v1294_v53, 0.0  ;;  %v4333_v38 = vld [vmem:[#allocation5 + $0x524] ss:$8 sps:$4 sm:$0xff]  }
 0x249   :  { %v1289_v63 = vadd.f32 %v3846_v34, %v1288_v40  ;;  %v1304_v2 = vmax.f32 %v1286_v57, 0.0  ;;  %v4330_v57 = vld [vmem:[#allocation5 + $0x554] ss:$8 sps:$4 sm:$0xff]  }
 0x24a   :  { %v1307_v1 = vmax.f32 %v1297_v60, 0.0  ;;  %v4336_v60 = vld [vmem:[#allocation5 + $0x584] ss:$8 sps:$4 sm:$0xff]   ;;  %v4339_v40 = vld [vmem:[#allocation5 + $0x534] ss:$8 sps:$4 sm:$0xff]  }
 0x24b   :  { %v1305_v4 = vmax.f32 %v1289_v63, 0.0  ;;  %v4334_v63 = vld [vmem:[#allocation5 + $0x580] ss:$8 sps:$4 sm:$0xff]  }
 0x24c   :  { %v1311_v5 = vpack.c.bf16 %v1307_v1, %v1306_v0 }
 0x24d   :  { %v1310_v11 = vpack.c.bf16 %v1305_v4, %v1304_v2  ;;  %v4337_v2 = vld [vmem:[#allocation5 + $0x530] ss:$8 sps:$4 sm:$0xff]  }
 0x24e   :  { %v1328_v13 = vpack.i.b16 %v1311_v5, %v1309_v47  ;;  %v1331_v14 = vshrl.u32 %v1311_v5, 16  ;;  %v4327_v47 = vld [vmem:[#allocation5 + $0x4f4] ss:$8 sps:$4 sm:$0xff]   ;;  %v4345_v5 = vld [vmem:[#allocation5 + $0x564] ss:$8 sps:$4 sm:$0xff]  }
 0x24f   :  { %v4680_v16 = vpack.i.b16 %v1310_v11, %v1308_v48  ;;  %v1317_v17 = vshrl.u32 %v1310_v11, 16  ;;  %v4340_v11 = vld [vmem:[#allocation5 + $0x590] ss:$8 sps:$4 sm:$0xff]  }
 0x250   :  { %v1332_v18 = vpack.i.b16 %v1331_v14, %v1330_v12  ;;  %v1432_v56 = vcombine.high %v1328_v13, %v4672_v7  ;;  %v4684_v19 = vrot.slane %v1328_v13, %v4675_v9  ;;  %v4343_v13 = vld [vmem:[#allocation5 + $0x560] ss:$8 sps:$4 sm:$0xff]   ;;  %v4348_v14 = vld [vmem:[#allocation5 + $0x5c4] ss:$8 sps:$4 sm:$0xff]  }
 0x251   :  { %v4686_v20 = vpack.i.b16 %v1317_v17, %v1316_v54  ;;  %v1341_v21 = vrot.slane %v4680_v16, %v4675_v9  ;;  %v1334_v0 = vcombine.high %v4680_v16, %v4672_v7  ;;  %v4351_v16 = vld [vmem:[#allocation5 + $0x574] ss:$8 sps:$4 sm:$0xff]   ;;  %v4346_v17 = vld [vmem:[#allocation5 + $0x5c0] ss:$8 sps:$4 sm:$0xff]  }
 0x252   :  { %v1446_v23 = vrot.slane %v1432_v56, %v4675_v9  ;;  %v1447_v25 = vcombine.high %v4684_v19, %v4588_v6  ;;  %v1481_v26 = vcombine.high %v1332_v18, %v4672_v7  ;;  %v1488_v10 = vrot.slane %v1332_v18, %v4675_v9  ;;  %v4349_v56 = vld [vmem:[#allocation5 + $0x570] ss:$8 sps:$4 sm:$0xff]  }
 0x253   :  { %v1356_v28 = vrot.slane %v1341_v21, %v4678_v15  ;;  %v1390_v39 = vrot.slane %v4686_v20, %v4675_v9  ;;  %v1349_v44 = vcombine.high %v1341_v21, %v4588_v6  ;;  %v1348_v12 = vrot.slane %v1334_v0, %v4675_v9  ;;  %v4354_v21 = vld [vmem:[#allocation5 + $0x5d4] ss:$8 sps:$4 sm:$0xff]   ;;  %v4396_v0 = vld [vmem:[#allocation5 + $0x6c4] ss:$8 sps:$4 sm:$0xff]  }
 0x254   :  { %v4697_v29 = vrot.slane %v1447_v25, %v4678_v15  ;;  %v4700_v30 = vrot.slane %v1446_v23, %v4678_v15  ;;  %v1495_v31 = vrot.slane %v1481_v26, %v4675_v9  ;;  %v4704_v32 = vrot.slane %v1488_v10, %v4678_v15  ;;  %v4352_v25 = vld [vmem:[#allocation5 + $0x5d0] ss:$8 sps:$4 sm:$0xff]   ;;  %v4355_v26 = vld [vmem:[#allocation5 + $0x5a0] ss:$8 sps:$4 sm:$0xff]  }
 0x255   :  { %3859 = vmatmul.mubr.msk.bf16.vlgmr.msra.gmra.mrb[32].mxu1 %vm1550_vm0, %v1356_v28  ;;  %v1379_v34 = vcombine.high %v1356_v28, %v4588_v6  ;;  %v1496_v37 = vcombine.high %v1488_v10, %v4588_v6  ;;  %v1462_v41 = vcombine.high %v1446_v23, %v4588_v6  ;;  %v1405_v46 = vrot.slane %v1390_v39, %v4678_v15  ;;  %v4357_v23 = vld [vmem:[#allocation5 + $0x5a4] ss:$8 sps:$4 sm:$0xff]  }
 0x256   :  { %1619 = vmatpush1.bf16.msra.mxu1 %v4307_v27  ;;  %1650 = vmatprep.mubr.bf16.mxu1 %v4588_v6  ;;  %v1511_v42 = vcombine.high %v1495_v31, %v4588_v6  ;;  %v4722_v49 = vrot.slane %v1495_v31, %v4678_v15  ;;  %v1363_v53 = vrot.slane %v1349_v44, %v4678_v15  ;;  %v4360_v27 = vld [vmem:[#allocation5 + $0x604] ss:$8 sps:$4 sm:$0xff]   ;;  %v4358_v31 = vld [vmem:[#allocation5 + $0x600] ss:$8 sps:$4 sm:$0xff]   ;;  %v4373_v44 = vld [vmem:[#allocation5 + $0x5f0] ss:$8 sps:$4 sm:$0xff]  }
 0x257   :  { %1620 = vmatprep.subr.bf16.mxu1 %v4315_v8  ;;  %3869 = vmatmul.mubr.msk.bf16.vlgmr.msra.gmra.mrb[40].mxu0 %vm1550_vm0, %v1379_v34  ;;  %v4719_v48 = vrot.slane %v1496_v37, %v4678_v15  ;;  %v4725_v50 = vrot.slane %v1462_v41, %v4678_v15  ;;  %v1428_v61 = vcombine.high %v1405_v46, %v4588_v6  ;;  %v4363_v8 = vld [vmem:[#allocation5 + $0x5b4] ss:$8 sps:$4 sm:$0xff]   ;;  %v4361_v34 = vld [vmem:[#allocation5 + $0x5b0] ss:$8 sps:$4 sm:$0xff]  }
 0x258   :  { %1811 = vmatpush1.bf16.msra.mxu0 %v4310_v33  ;;  %1842 = vmatprep.mubr.bf16.mxu0 %v4588_v6  ;;  %v4729_v52 = vrot.slane %v1511_v42, %v4678_v15  ;;  %v1380_v1 = vcombine.high %v1363_v53, %v4588_v6  ;;  %v1398_v4 = vcombine.high %v1390_v39, %v4588_v6  ;;  %v4367_v39 = vld [vmem:[#allocation5 + $0x5e0] ss:$8 sps:$4 sm:$0xff]  }
 0x259   :  { %1812 = vmatprep.subr.bf16.mxu0 %v4318_v36  ;;  %v1371_v18 = vrot.slane %v1348_v12, %v4678_v15  ;;  %v1383_v10 = vcombine.high %v4686_v20, %v4672_v7  ;;  %v4369_v7 = vld [vmem:[#allocation5 + $0x5e4] ss:$8 sps:$4 sm:$0xff]   ;;  %v4364_v20 = vld [vmem:[#allocation5 + $0x610] ss:$8 sps:$4 sm:$0xff]   ;;  %v1364_v37 = vcombine.high %v1348_v12, %v4588_v6  ;;  %v4370_v42 = vld [vmem:[#allocation5 + $0x640] ss:$8 sps:$4 sm:$0xff]  }
 0x25a   :  { %1621 = vmatpush1.bf16.msra.mxu1 %v4313_v35  ;;  %v1412_v54 = vrot.slane %v1398_v4, %v4678_v15  ;;  %v4366_v35 = vld [vmem:[#allocation5 + $0x614] ss:$8 sps:$4 sm:$0xff]   ;;  %v1454_v4 = vrot.slane %v4684_v19, %v4678_v15  ;;  %v4405_v12 = vld [vmem:[#allocation5 + $0x6a4] ss:$8 sps:$4 sm:$0xff]  }
 0x25b   :  { %1746 = vmatprep.subr.bf16.mxu1 %v4321_v22  ;;  %v1381_v33 = vcombine.high %v1371_v18, %v4588_v6  ;;  %v1397_v36 = vrot.slane %v1383_v10, %v4675_v9  ;;  %v4372_v22 = vld [vmem:[#allocation5 + $0x644] ss:$8 sps:$4 sm:$0xff]   ;;  %v4375_v9 = vld [vmem:[#allocation5 + $0x5f4] ss:$8 sps:$4 sm:$0xff]   ;;  %v4418_v10 = vld [vmem:[#allocation5 + $0x740] ss:$8 sps:$4 sm:$0xff]  }
 0x25c   :  { %1813 = vmatpush1.bf16.msra.mxu0 %v4316_v43  ;;  %v1429_v28 = vcombine.high %v1412_v54, %v4588_v6  ;;  %v1378_v43 = vrot.slane %v1364_v37, %v4678_v15  ;;  %v4411_v19 = vld [vmem:[#allocation5 + $0x6b4] ss:$8 sps:$4 sm:$0xff]   ;;  %v1478_v37 = vcombine.high %v4697_v29, %v4588_v6 }
 0x25d   :  { %3864 = vmatmul.mubr.msk.bf16.vlgmr.msra.gmra.mrb[36].mxu1 %vm1550_vm0, %v1405_v46  ;;  %1938 = vmatprep.subr.bf16.mxu0 %v4324_v45  ;;  %v1420_v41 = vrot.slane %v1397_v36, %v4678_v15  ;;  %v4381_v45 = vld [vmem:[#allocation5 + $0x624] ss:$8 sps:$4 sm:$0xff]   ;;  %v4376_v46 = vld [vmem:[#allocation5 + $0x650] ss:$8 sps:$4 sm:$0xff]  }
 0x25e   :  { %1747 = vmatpush1.bf16.msra.mxu1 %v4319_v24  ;;  %1778 = vmatprep.mubr.bf16.mxu1 %v4588_v6  ;;  %v4378_v24 = vld [vmem:[#allocation5 + $0x654] ss:$8 sps:$4 sm:$0xff]  }
 0x25f   :  { %1748 = vmatprep.subr.bf16.mxu1 %v4327_v47  ;;  %3879 = vmatmul.mubr.msk.bf16.vlgmr.msra.gmra.mrb[44].mxu0 %vm1550_vm0, %v1363_v53  ;;  %v4379_v47 = vld [vmem:[#allocation5 + $0x620] ss:$8 sps:$4 sm:$0xff]   ;;  %v1430_v53 = vcombine.high %v1420_v41, %v4588_v6 }
 0x260   :  { %1939 = vmatpush1.bf16.msra.mxu0 %v4322_v51  ;;  %1970 = vmatprep.mubr.bf16.mxu0 %v4588_v6  ;;  %v4384_v51 = vld [vmem:[#allocation5 + $0x684] ss:$8 sps:$4 sm:$0xff]  }
 0x261   :  { %1940 = vmatprep.subr.bf16.mxu0 %v4330_v57  ;;  %v4382_v57 = vld [vmem:[#allocation5 + $0x680] ss:$8 sps:$4 sm:$0xff]  }
 0x262   :  { %1749 = vmatpush1.bf16.msra.mxu1 %v4325_v55  ;;  %v4387_v55 = vld [vmem:[#allocation5 + $0x634] ss:$8 sps:$4 sm:$0xff]  }
 0x263   :  { %1874 = vmatprep.subr.bf16.mxu1 %v4333_v38  ;;  %v1382_v38 = vcombine.high %v1378_v43, %v4588_v6 }
 0x264   :  { %1941 = vmatpush1.bf16.msra.mxu0 %v4328_v58  ;;  %v4385_v58 = vld [vmem:[#allocation5 + $0x630] ss:$8 sps:$4 sm:$0xff]  }
 0x265   :  { %3874 = vmatmul.mubr.msk.bf16.vlgmr.msra.gmra.mrb[40].mxu1 %vm1550_vm0, %v1428_v61  ;;  %2066 = vmatprep.subr.bf16.mxu0 %v4336_v60  ;;  %v1413_v60 = vcombine.high %v1397_v36, %v4588_v6  ;;  %v4393_v61 = vld [vmem:[#allocation5 + $0x664] ss:$8 sps:$4 sm:$0xff]   ;;  %v1526_v36 = vcombine.high %v4704_v32, %v4588_v6 }
 0x266   :  { %1875 = vmatpush1.bf16.msra.mxu1 %v4331_v59  ;;  %1906 = vmatprep.mubr.bf16.mxu1 %v4588_v6  ;;  %v4390_v59 = vld [vmem:[#allocation5 + $0x694] ss:$8 sps:$4 sm:$0xff]  }
 0x267   :  { %1876 = vmatprep.subr.bf16.mxu1 %v4339_v40  ;;  %3889 = vmatmul.mubr.msk.bf16.vlgmr.msra.gmra.mrb[48].mxu0 %vm1550_vm0, %v1380_v1  ;;  %v4388_v40 = vld [vmem:[#allocation5 + $0x690] ss:$8 sps:$4 sm:$0xff]   ;;  %v1427_v1 = vrot.slane %v1413_v60, %v4678_v15  ;;  %v4465_v60 = vld [vmem:[#allocation5 + $0x7e4] ss:$8 sps:$4 sm:$0xff]  }
 0x268   :  { %2067 = vmatpush1.bf16.msra.mxu0 %v4334_v63  ;;  %2098 = vmatprep.mubr.bf16.mxu0 %v4588_v6  ;;  %v4391_v63 = vld [vmem:[#allocation5 + $0x660] ss:$8 sps:$4 sm:$0xff]  }
 0x269   :  { %2068 = vmatprep.subr.bf16.mxu0 %v4342_v3  ;;  %v4394_v3 = vld [vmem:[#allocation5 + $0x6c0] ss:$8 sps:$4 sm:$0xff]   ;;  %v1431_v15 = vcombine.high %v1427_v1, %v4588_v6 }
 0x26a   :  { %1877 = vmatpush1.bf16.msra.mxu1 %v4337_v2  ;;  %v4399_v2 = vld [vmem:[#allocation5 + $0x674] ss:$8 sps:$4 sm:$0xff]  }
 0x26b   :  { %2002 = vmatprep.subr.bf16.mxu1 %v4345_v5  ;;  %v4397_v5 = vld [vmem:[#allocation5 + $0x670] ss:$8 sps:$4 sm:$0xff]  }
 0x26c   :  { %2069 = vmatpush1.bf16.msra.mxu0 %v4340_v11  ;;  %v4402_v11 = vld [vmem:[#allocation5 + $0x6d4] ss:$8 sps:$4 sm:$0xff]  }
 0x26d   :  { %3884 = vmatmul.mubr.msk.bf16.vlgmr.msra.gmra.mrb[44].mxu1 %vm1550_vm0, %v1412_v54  ;;  %2194 = vmatprep.subr.bf16.mxu0 %v4348_v14  ;;  %v4403_v14 = vld [vmem:[#allocation5 + $0x6a0] ss:$8 sps:$4 sm:$0xff]   ;;  %v4408_v54 = vld [vmem:[#allocation5 + $0x704] ss:$8 sps:$4 sm:$0xff]  }
 0x26e   :  { %2003 = vmatpush1.bf16.msra.mxu1 %v4343_v13  ;;  %2034 = vmatprep.mubr.bf16.mxu1 %v4588_v6  ;;  %v4400_v13 = vld [vmem:[#allocation5 + $0x6d0] ss:$8 sps:$4 sm:$0xff]  }
 0x26f   :  { %2004 = vmatprep.subr.bf16.mxu1 %v4351_v16  ;;  %3899 = vmatmul.mubr.msk.bf16.vlgmr.msra.gmra.mrb[52].mxu0 %vm1550_vm0, %v1371_v18  ;;  %v4406_v16 = vld [vmem:[#allocation5 + $0x700] ss:$8 sps:$4 sm:$0xff]   ;;  %v4409_v18 = vld [vmem:[#allocation5 + $0x6b0] ss:$8 sps:$4 sm:$0xff]  }
 0x270   :  { %2195 = vmatpush1.bf16.msra.mxu0 %v4346_v17  ;;  %2226 = vmatprep.mubr.bf16.mxu0 %v4588_v6  ;;  %v1477_v17 = vcombine.high %v1454_v4, %v4588_v6 }
 0x271   :  { %2196 = vmatprep.subr.bf16.mxu0 %v4354_v21  ;;  %v4417_v21 = vld [vmem:[#allocation5 + $0x6e4] ss:$8 sps:$4 sm:$0xff]  }
 0x272   :  { %2005 = vmatpush1.bf16.msra.mxu1 %v4349_v56  ;;  %v4414_v56 = vld [vmem:[#allocation5 + $0x714] ss:$8 sps:$4 sm:$0xff]  }
 0x273   :  { %2130 = vmatprep.subr.bf16.mxu1 %v4357_v23  ;;  %v4412_v23 = vld [vmem:[#allocation5 + $0x710] ss:$8 sps:$4 sm:$0xff]  }
 0x274   :  { %2197 = vmatpush1.bf16.msra.mxu0 %v4352_v25  ;;  %v4415_v25 = vld [vmem:[#allocation5 + $0x6e0] ss:$8 sps:$4 sm:$0xff]  }
 0x275   :  { %3894 = vmatmul.mubr.msk.bf16.vlgmr.msra.gmra.mrb[48].mxu1 %vm1550_vm0, %v1429_v28  ;;  %2322 = vmatprep.subr.bf16.mxu0 %v4360_v27  ;;  %v4423_v27 = vld [vmem:[#allocation5 + $0x6f4] ss:$8 sps:$4 sm:$0xff]   ;;  %v4421_v28 = vld [vmem:[#allocation5 + $0x6f0] ss:$8 sps:$4 sm:$0xff]  }
 0x276   :  { %2131 = vmatpush1.bf16.msra.mxu1 %v4355_v26  ;;  %2162 = vmatprep.mubr.bf16.mxu1 %v4588_v6  ;;  %v4420_v26 = vld [vmem:[#allocation5 + $0x744] ss:$8 sps:$4 sm:$0xff]  }
 0x277   :  { %2132 = vmatprep.subr.bf16.mxu1 %v4363_v8  ;;  %3909 = vmatmul.mubr.msk.bf16.vlgmr.msra.gmra.mrb[56].mxu0 %vm1550_vm0, %v1381_v33  ;;  %v4426_v8 = vld [vmem:[#allocation5 + $0x754] ss:$8 sps:$4 sm:$0xff]   ;;  %v4424_v33 = vld [vmem:[#allocation5 + $0x750] ss:$8 sps:$4 sm:$0xff]  }
 0x278   :  { %2323 = vmatpush1.bf16.msra.mxu0 %v4358_v31  ;;  %2354 = vmatprep.mubr.bf16.mxu0 %v4588_v6  ;;  %v4429_v31 = vld [vmem:[#allocation5 + $0x724] ss:$8 sps:$4 sm:$0xff]  }
 0x279   :  { %2324 = vmatprep.subr.bf16.mxu0 %v4366_v35  ;;  %v4432_v35 = vld [vmem:[#allocation5 + $0x784] ss:$8 sps:$4 sm:$0xff]  }
 0x27a   :  { %2133 = vmatpush1.bf16.msra.mxu1 %v4361_v34  ;;  %v4427_v34 = vld [vmem:[#allocation5 + $0x720] ss:$8 sps:$4 sm:$0xff]  }
 0x27b   :  { %2258 = vmatprep.subr.bf16.mxu1 %v4369_v7  ;;  %v4435_v7 = vld [vmem:[#allocation5 + $0x734] ss:$8 sps:$4 sm:$0xff]  }
 0x27c   :  { %2325 = vmatpush1.bf16.msra.mxu0 %v4364_v20  ;;  %v4430_v20 = vld [vmem:[#allocation5 + $0x780] ss:$8 sps:$4 sm:$0xff]  }
 0x27d   :  { %3904 = vmatmul.mubr.msk.bf16.vlgmr.msra.gmra.mrb[52].mxu1 %vm1550_vm0, %v1420_v41  ;;  %2450 = vmatprep.subr.bf16.mxu0 %v4372_v22  ;;  %v4438_v22 = vld [vmem:[#allocation5 + $0x794] ss:$8 sps:$4 sm:$0xff]   ;;  %v4441_v41 = vld [vmem:[#allocation5 + $0x764] ss:$8 sps:$4 sm:$0xff]  }
 0x27e   :  { %2259 = vmatpush1.bf16.msra.mxu1 %v4367_v39  ;;  %2290 = vmatprep.mubr.bf16.mxu1 %v4588_v6  ;;  %v4433_v39 = vld [vmem:[#allocation5 + $0x730] ss:$8 sps:$4 sm:$0xff]  }
 0x27f   :  { %2260 = vmatprep.subr.bf16.mxu1 %v4375_v9  ;;  %3919 = vmatmul.mubr.msk.bf16.vlgmr.msra.gmra.mrb[60].mxu0 %vm1550_vm0, %v1378_v43  ;;  %v4439_v9 = vld [vmem:[#allocation5 + $0x760] ss:$8 sps:$4 sm:$0xff]   ;;  %v4447_v43 = vld [vmem:[#allocation5 + $0x774] ss:$8 sps:$4 sm:$0xff]  }
 0x280   :  { %2451 = vmatpush1.bf16.msra.mxu0 %v4370_v42  ;;  %2482 = vmatprep.mubr.bf16.mxu0 %v4588_v6  ;;  %v4444_v42 = vld [vmem:[#allocation5 + $0x7c4] ss:$8 sps:$4 sm:$0xff]  }
 0x281   :  { %2452 = vmatprep.subr.bf16.mxu0 %v4378_v24  ;;  %v4450_v24 = vld [vmem:[#allocation5 + $0x7d4] ss:$8 sps:$4 sm:$0xff]  }
 0x282   :  { %2261 = vmatpush1.bf16.msra.mxu1 %v4373_v44  ;;  %v4445_v44 = vld [vmem:[#allocation5 + $0x770] ss:$8 sps:$4 sm:$0xff]  }
 0x283   :  { %2386 = vmatprep.subr.bf16.mxu1 %v4381_v45  ;;  %v4453_v45 = vld [vmem:[#allocation5 + $0x7a4] ss:$8 sps:$4 sm:$0xff]  }
 0x284   :  { %2453 = vmatpush1.bf16.msra.mxu0 %v4376_v46  ;;  %v4448_v46 = vld [vmem:[#allocation5 + $0x7d0] ss:$8 sps:$4 sm:$0xff]  }
 0x285   :  { %3914 = vmatmul.mubr.msk.bf16.vlgmr.msra.gmra.mrb[56].mxu1 %vm1550_vm0, %v1430_v53  ;;  %2578 = vmatprep.subr.bf16.mxu0 %v4384_v51  ;;  %v4456_v51 = vld [vmem:[#allocation5 + $0x804] ss:$8 sps:$4 sm:$0xff]   ;;  %v1527_v53 = vcombine.high %v4719_v48, %v4588_v6 }
 0x286   :  { %2387 = vmatpush1.bf16.msra.mxu1 %v4379_v47  ;;  %2418 = vmatprep.mubr.bf16.mxu1 %v4588_v6  ;;  %v4451_v47 = vld [vmem:[#allocation5 + $0x7a0] ss:$8 sps:$4 sm:$0xff]  }
 0x287   :  { %2388 = vmatprep.subr.bf16.mxu1 %v4387_v55  ;;  %3929 = vmatmul.mubr.msk.bf16.vlgmr.msra.gmra.mrb[64].mxu0 %vm1550_vm0, %v1382_v38  ;;  %v4459_v55 = vld [vmem:[#allocation5 + $0x7b4] ss:$8 sps:$4 sm:$0xff]   ;;  %v1479_v38 = vcombine.high %v4700_v30, %v4588_v6 }
 0x288   :  { %2579 = vmatpush1.bf16.msra.mxu0 %v4382_v57  ;;  %2610 = vmatprep.mubr.bf16.mxu0 %v4588_v6  ;;  %v4454_v57 = vld [vmem:[#allocation5 + $0x800] ss:$8 sps:$4 sm:$0xff]  }
 0x289   :  { %2580 = vmatprep.subr.bf16.mxu0 %v4390_v59  ;;  %v4462_v59 = vld [vmem:[#allocation5 + $0x814] ss:$8 sps:$4 sm:$0xff]  }
 0x28a   :  { %2389 = vmatpush1.bf16.msra.mxu1 %v4385_v58  ;;  %v4457_v58 = vld [vmem:[#allocation5 + $0x7b0] ss:$8 sps:$4 sm:$0xff]  }
 0x28b   :  { %2514 = vmatprep.subr.bf16.mxu1 %v4393_v61  ;;  %v4463_v61 = vld [vmem:[#allocation5 + $0x7e0] ss:$8 sps:$4 sm:$0xff]  }
 0x28c   :  { %2581 = vmatpush1.bf16.msra.mxu0 %v4388_v40  ;;  %v4468_v40 = vld [vmem:[#allocation5 + $0x844] ss:$8 sps:$4 sm:$0xff]  }
 0x28d   :  { %3924 = vmatmul.mubr.msk.bf16.vlgmr.msra.gmra.mrb[60].mxu1 %vm1550_vm0, %v1427_v1  ;;  %2706 = vmatprep.subr.bf16.mxu0 %v4396_v0  ;;  %v4469_v0 = vld [vmem:[#allocation5 + $0x7f0] ss:$8 sps:$4 sm:$0xff]   ;;  %v4474_v1 = vld [vmem:[#allocation5 + $0x854] ss:$8 sps:$4 sm:$0xff]  }
 0x28e   :  { %2515 = vmatpush1.bf16.msra.mxu1 %v4391_v63  ;;  %2546 = vmatprep.mubr.bf16.mxu1 %v4588_v6  ;;  %v4471_v63 = vld [vmem:[#allocation5 + $0x7f4] ss:$8 sps:$4 sm:$0xff]  }
 0x28f   :  { %2516 = vmatprep.subr.bf16.mxu1 %v4399_v2  ;;  %3939 = vmatmul.mubr.msk.bf16.vlgmr.msra.gmra.mrb[68].mxu0 %vm1550_vm0, %v1454_v4  ;;  %v4477_v2 = vld [vmem:[#allocation5 + $0x824] ss:$8 sps:$4 sm:$0xff]   ;;  %v4475_v4 = vld [vmem:[#allocation5 + $0x820] ss:$8 sps:$4 sm:$0xff]  }
 0x290   :  { %2707 = vmatpush1.bf16.msra.mxu0 %v4394_v3  ;;  %2738 = vmatprep.mubr.bf16.mxu0 %v4588_v6  ;;  %v4472_v3 = vld [vmem:[#allocation5 + $0x850] ss:$8 sps:$4 sm:$0xff]  }
 0x291   :  { %2708 = vmatprep.subr.bf16.mxu0 %v4402_v11  ;;  %v4480_v11 = vld [vmem:[#allocation5 + $0x834] ss:$8 sps:$4 sm:$0xff]  }
 0x292   :  { %2517 = vmatpush1.bf16.msra.mxu1 %v4397_v5  ;;  %v1528_v5 = vcombine.high %v4722_v49, %v4588_v6 }
 0x293   :  { %2642 = vmatprep.subr.bf16.mxu1 %v4405_v12  ;;  %v1480_v12 = vcombine.high %v4725_v50, %v4588_v6 }
 0x294   :  { %2709 = vmatpush1.bf16.msra.mxu0 %v4400_v13  ;;  %v4478_v13 = vld [vmem:[#allocation5 + $0x830] ss:$8 sps:$4 sm:$0xff]  }
 0x295   :  { %3934 = vmatmul.mubr.msk.bf16.vlgmr.msra.gmra.mrb[64].mxu1 %vm1550_vm0, %v1431_v15  ;;  %2834 = vmatprep.subr.bf16.mxu0 %v4408_v54  ;;  %v4481_v54 = vld [vmem:[#allocation5 + $0x860] ss:$8 sps:$4 sm:$0xff]   ;;  %v4484_v15 = vld [vmem:[#allocation5 + $0x870] ss:$8 sps:$4 sm:$0xff]  }
 0x296   :  { %2643 = vmatpush1.bf16.msra.mxu1 %v4403_v14  ;;  %2674 = vmatprep.mubr.bf16.mxu1 %v4588_v6  ;;  %v4483_v14 = vld [vmem:[#allocation5 + $0x864] ss:$8 sps:$4 sm:$0xff]  }
 0x297   :  { %2644 = vmatprep.subr.bf16.mxu1 %v4411_v19  ;;  %3949 = vmatmul.mubr.msk.bf16.vlgmr.msra.gmra.mrb[72].mxu0 %vm1550_vm0, %v1477_v17 }
 0x298   :  { %2835 = vmatpush1.bf16.msra.mxu0 %v4406_v16  ;;  %2866 = vmatprep.mubr.bf16.mxu0 %v4588_v6 }
 0x299   :  { %2836 = vmatprep.subr.bf16.mxu0 %v4414_v56 }
 0x29a   :  { %2645 = vmatpush1.bf16.msra.mxu1 %v4409_v18 }
 0x29b   :  { %2770 = vmatprep.subr.bf16.mxu1 %v4417_v21 }
 0x29c   :  { %2837 = vmatpush1.bf16.msra.mxu0 %v4412_v23 }
 0x29d   :  { %3944 = vmatmul.mubr.msk.bf16.vlgmr.msra.gmra.mrb[68].mxu1 %vm1550_vm0, %v4704_v32  ;;  %2962 = vmatprep.subr.bf16.mxu0 %v4420_v26  ;;  %v4436_v32 = vld [vmem:[#allocation5 + $0x790] ss:$8 sps:$4 sm:$0xff]  }
 0x29e   :  { %2771 = vmatpush1.bf16.msra.mxu1 %v4415_v25  ;;  %2802 = vmatprep.mubr.bf16.mxu1 %v4588_v6 }
 0x29f   :  { %2772 = vmatprep.subr.bf16.mxu1 %v4423_v27  ;;  %3959 = vmatmul.mubr.msk.bf16.vlgmr.msra.gmra.mrb[76].mxu0 %vm1550_vm0, %v4697_v29  ;;  %v4442_v29 = vld [vmem:[#allocation5 + $0x7c0] ss:$8 sps:$4 sm:$0xff]  }
 0x2a0   :  { %2963 = vmatpush1.bf16.msra.mxu0 %v4418_v10  ;;  %2994 = vmatprep.mubr.bf16.mxu0 %v4588_v6 }
 0x2a1   :  { %2964 = vmatprep.subr.bf16.mxu0 %v4426_v8 }
 0x2a2   :  { %2773 = vmatpush1.bf16.msra.mxu1 %v4421_v28 }
 0x2a3   :  { %2898 = vmatprep.subr.bf16.mxu1 %v4429_v31 }
 0x2a4   :  { %2965 = vmatpush1.bf16.msra.mxu0 %v4424_v33 }
 0x2a5   :  { %3954 = vmatmul.mubr.msk.bf16.vlgmr.msra.gmra.mrb[72].mxu1 %vm1550_vm0, %v1526_v36  ;;  %3090 = vmatprep.subr.bf16.mxu0 %v4432_v35 }
 0x2a6   :  { %2899 = vmatpush1.bf16.msra.mxu1 %v4427_v34  ;;  %2930 = vmatprep.mubr.bf16.mxu1 %v4588_v6 }
 0x2a7   :  { %2900 = vmatprep.subr.bf16.mxu1 %v4435_v7  ;;  %3969 = vmatmul.mubr.msk.bf16.vlgmr.msra.gmra.mrb[80].mxu0 %vm1550_vm0, %v1478_v37 }
 0x2a8   :  { %3091 = vmatpush1.bf16.msra.mxu0 %v4430_v20  ;;  %3122 = vmatprep.mubr.bf16.mxu0 %v4588_v6 }
 0x2a9   :  { %3092 = vmatprep.subr.bf16.mxu0 %v4438_v22 }
 0x2aa   :  { %2901 = vmatpush1.bf16.msra.mxu1 %v4433_v39 }
 0x2ab   :  { %3026 = vmatprep.subr.bf16.mxu1 %v4441_v41 }
 0x2ac   :  { %3093 = vmatpush1.bf16.msra.mxu0 %v4436_v32 }
 0x2ad   :  { %3964 = vmatmul.mubr.msk.bf16.vlgmr.msra.gmra.mrb[76].mxu1 %vm1550_vm0, %v4719_v48  ;;  %3218 = vmatprep.subr.bf16.mxu0 %v4444_v42  ;;  %v4460_v48 = vld [vmem:[#allocation5 + $0x810] ss:$8 sps:$4 sm:$0xff]  }
 0x2ae   :  { %3027 = vmatpush1.bf16.msra.mxu1 %v4439_v9  ;;  %3058 = vmatprep.mubr.bf16.mxu1 %v4588_v6 }
 0x2af   :  { %3028 = vmatprep.subr.bf16.mxu1 %v4447_v43  ;;  %3979 = vmatmul.mubr.msk.bf16.vlgmr.msra.gmra.mrb[84].mxu0 %vm1550_vm0, %v4700_v30  ;;  %v4466_v30 = vld [vmem:[#allocation5 + $0x840] ss:$8 sps:$4 sm:$0xff]  }
 0x2b0   :  { %3219 = vmatpush1.bf16.msra.mxu0 %v4442_v29  ;;  %3250 = vmatprep.mubr.bf16.mxu0 %v4588_v6 }
 0x2b1   :  { %3220 = vmatprep.subr.bf16.mxu0 %v4450_v24 }
 0x2b2   :  { %3029 = vmatpush1.bf16.msra.mxu1 %v4445_v44 }
 0x2b3   :  { %3154 = vmatprep.subr.bf16.mxu1 %v4453_v45 }
 0x2b4   :  { %3221 = vmatpush1.bf16.msra.mxu0 %v4448_v46 }
 0x2b5   :  { %3974 = vmatmul.mubr.msk.bf16.vlgmr.msra.gmra.mrb[80].mxu1 %vm1550_vm0, %v1527_v53  ;;  %3346 = vmatprep.subr.bf16.mxu0 %v4456_v51 }
 0x2b6   :  { %3155 = vmatpush1.bf16.msra.mxu1 %v4451_v47  ;;  %3186 = vmatprep.mubr.bf16.mxu1 %v4588_v6 }
 0x2b7   :  { %3156 = vmatprep.subr.bf16.mxu1 %v4459_v55  ;;  %3989 = vmatmul.mubr.msk.bf16.vlgmr.msra.gmra.mrb[88].mxu0 %vm1550_vm0, %v1479_v38 }
 0x2b8   :  { %3347 = vmatpush1.bf16.msra.mxu0 %v4454_v57  ;;  %3378 = vmatprep.mubr.bf16.mxu0 %v4588_v6 }
 0x2b9   :  { %3348 = vmatprep.subr.bf16.mxu0 %v4462_v59 }
 0x2ba   :  { %3157 = vmatpush1.bf16.msra.mxu1 %v4457_v58 }
 0x2bb   :  { %3282 = vmatprep.subr.bf16.mxu1 %v4465_v60 }
 0x2bc   :  { %3349 = vmatpush1.bf16.msra.mxu0 %v4460_v48 }
 0x2bd   :  { %3984 = vmatmul.mubr.msk.bf16.vlgmr.msra.gmra.mrb[84].mxu1 %vm1550_vm0, %v4722_v49  ;;  %3474 = vmatprep.subr.bf16.mxu0 %v4468_v40  ;;  %v4486_v49 = vld [vmem:[#allocation5 + $0x874] ss:$8 sps:$4 sm:$0xff]  }
 0x2be   :  { %3283 = vmatpush1.bf16.msra.mxu1 %v4463_v61  ;;  %3314 = vmatprep.mubr.bf16.mxu1 %v4588_v6 }
 0x2bf   :  { %3284 = vmatprep.subr.bf16.mxu1 %v4471_v63  ;;  %3999 = vmatmul.mubr.msk.bf16.vlgmr.msra.gmra.mrb[92].mxu0 %vm1550_vm0, %v4725_v50  ;;  %v1529_v50 = vcombine.high %v4729_v52, %v4588_v6 }
 0x2c0   :  { %3475 = vmatpush1.bf16.msra.mxu0 %v4466_v30  ;;  %3506 = vmatprep.mubr.bf16.mxu0 %v4588_v6 }
 0x2c1   :  { %3476 = vmatprep.subr.bf16.mxu0 %v4474_v1 }
 0x2c2   :  { %3285 = vmatpush1.bf16.msra.mxu1 %v4469_v0 }
 0x2c3   :  { %3410 = vmatprep.subr.bf16.mxu1 %v4477_v2 }
 0x2c4   :  { %3477 = vmatpush1.bf16.msra.mxu0 %v4472_v3 }
 0x2c5   :  { %3994 = vmatmul.mubr.msk.bf16.vlgmr.msra.gmra.mrb[88].mxu1 %vm1550_vm0, %v1528_v5 }
 0x2c6   :  { %3411 = vmatpush1.bf16.msra.mxu1 %v4475_v4  ;;  %3442 = vmatprep.mubr.bf16.mxu1 %v4588_v6 }
 0x2c7   :  { %3412 = vmatprep.subr.bf16.mxu1 %v4480_v11  ;;  %4009 = vmatmul.mubr.msk.bf16.vlgmr.msra.gmra.mrb[96].mxu0 %vm1550_vm0, %v1480_v12 }
 0x2ca   :  { %3413 = vmatpush1.bf16.msra.mxu1 %v4478_v13 }
 0x2cb   :  { %3538 = vmatprep.subr.bf16.mxu1 %v4483_v14 }
 0x2cd   :  { %4004 = vmatmul.mubr.msk.bf16.vlgmr.msra.gmra.mrb[92].mxu1 %vm1550_vm0, %v4729_v52 }
 0x2ce   :  { %3539 = vmatpush1.bf16.msra.mxu1 %v4481_v54  ;;  %3570 = vmatprep.mubr.bf16.mxu1 %v4588_v6 }
 0x2cf   :  { %3540 = vmatprep.subr.bf16.mxu1 %v4486_v49 }
 0x2d2   :  { %3541 = vmatpush1.bf16.msra.mxu1 %v4484_v15 }
 0x2d5   :  { %4014 = vmatmul.mubr.msk.bf16.vlgmr.msra.gmra.mrb[96].mxu1 %vm1550_vm0, %v1529_v50 }
 0x328   :  { %v1588_v19 = vpop.f32.mrb[32].mxu1 }
 0x329   :  { %v1590_v16 = vpop.f32.mrb[33].mxu1  ;;  %v3580_v27 = vsel %vm3579_vm1, %v1588_v19, 0.0 }
 0x32a   :  { %v1592_v17 = vpop.f32.mrb[34].mxu1  ;;  %v1716_v18 = vpop.f32.mrb[40].mxu0  ;;  %v3643_v8 = vsel %vm3579_vm1, %v1590_v16, 0.0 }
 0x32b   :  { %v1593_v56 = vpop.f32.mrb[35].mxu1  ;;  %v1718_v21 = vpop.f32.mrb[41].mxu0  ;;  %v3583_v33 = vsel %vm3579_vm1, %v1716_v18, 0.0 }
 0x32c   :  { %v1720_v23 = vpop.f32.mrb[42].mxu0  ;;  %v3646_v7 = vsel %vm3579_vm1, %v1718_v21, 0.0 }
 0x32d   :  { %v1721_v25 = vpop.f32.mrb[43].mxu0 }
 0x330   :  { %v1652_v26 = vpop.f32.mrb[36].mxu1 }
 0x331   :  { %v3581_v10 = vsel %vm3579_vm1, %v1652_v26, 0.0  ;;  %v1654_v28 = vpop.f32.mrb[37].mxu1 }
 0x332   :  { %v3582_v6 = vadd.f32 %v3581_v10, %v3580_v27  ;;  %v3644_v52 = vsel %vm3579_vm1, %v1654_v28, 0.0  ;;  %v1656_v31 = vpop.f32.mrb[38].mxu1  ;;  %v1844_v35 = vpop.f32.mrb[44].mxu0 }
 0x333   :  { %v3645_v34 = vadd.f32 %v3644_v52, %v3643_v8  ;;  %v1657_v36 = vpop.f32.mrb[39].mxu1  ;;  %v1846_v20 = vpop.f32.mrb[45].mxu0  ;;  %v3587_v24 = vsel %vm3579_vm1, %v1844_v35, 0.0 }
 0x334   :  { %v3584_v37 = vadd.f32 %v3583_v33, %v3582_v6  ;;  %v1848_v39 = vpop.f32.mrb[46].mxu0  ;;  %v3650_v51 = vsel %vm3579_vm1, %v1846_v20, 0.0 }
 0x335   :  { %v3647_v22 = vadd.f32 %v3646_v7, %v3645_v34  ;;  %v1849_v41 = vpop.f32.mrb[47].mxu0 }
 0x338   :  { %v1780_v32 = vpop.f32.mrb[40].mxu1 }
 0x339   :  { %v3585_v9 = vsel %vm3579_vm1, %v1780_v32, 0.0  ;;  %v1782_v42 = vpop.f32.mrb[41].mxu1 }
 0x33a   :  { %v3586_v43 = vadd.f32 %v3585_v9, %v3584_v37  ;;  %v3648_v29 = vsel %vm3579_vm1, %v1782_v42, 0.0  ;;  %v1784_v44 = vpop.f32.mrb[42].mxu1  ;;  %v1972_v46 = vpop.f32.mrb[48].mxu0 }
 0x33b   :  { %v3649_v45 = vadd.f32 %v3648_v29, %v3647_v22  ;;  %v1785_v47 = vpop.f32.mrb[43].mxu1  ;;  %v1974_v53 = vpop.f32.mrb[49].mxu0  ;;  %v3591_v30 = vsel %vm3579_vm1, %v1972_v46, 0.0 }
 0x33c   :  { %v3588_v55 = vadd.f32 %v3587_v24, %v3586_v43  ;;  %v1976_v57 = vpop.f32.mrb[50].mxu0  ;;  %v3654_v3 = vsel %vm3579_vm1, %v1974_v53, 0.0 }
 0x33d   :  { %v3651_v38 = vadd.f32 %v3650_v51, %v3649_v45  ;;  %v1977_v58 = vpop.f32.mrb[51].mxu0 }
 0x340   :  { %v1908_v59 = vpop.f32.mrb[44].mxu1 }
 0x341   :  { %v3589_v60 = vsel %vm3579_vm1, %v1908_v59, 0.0  ;;  %v1910_v48 = vpop.f32.mrb[45].mxu1 }
 0x342   :  { %v3590_v61 = vadd.f32 %v3589_v60, %v3588_v55  ;;  %v3652_v40 = vsel %vm3579_vm1, %v1910_v48, 0.0  ;;  %v1912_v63 = vpop.f32.mrb[46].mxu1  ;;  %v2100_v1 = vpop.f32.mrb[52].mxu0 }
 0x343   :  { %v3653_v0 = vadd.f32 %v3652_v40, %v3651_v38  ;;  %v1913_v2 = vpop.f32.mrb[47].mxu1  ;;  %v2102_v4 = vpop.f32.mrb[53].mxu0  ;;  %v3595_v16 = vsel %vm3579_vm1, %v2100_v1, 0.0 }
 0x344   :  { %v3592_v5 = vadd.f32 %v3591_v30, %v3590_v61  ;;  %v2104_v11 = vpop.f32.mrb[54].mxu0  ;;  %v3658_v21 = vsel %vm3579_vm1, %v2102_v4, 0.0 }
 0x345   :  { %v3655_v12 = vadd.f32 %v3654_v3, %v3653_v0  ;;  %v2105_v13 = vpop.f32.mrb[55].mxu0 }
 0x348   :  { %v2036_v14 = vpop.f32.mrb[48].mxu1 }
 0x349   :  { %v3593_v54 = vsel %vm3579_vm1, %v2036_v14, 0.0  ;;  %v2038_v49 = vpop.f32.mrb[49].mxu1 }
 0x34a   :  { %v3594_v15 = vadd.f32 %v3593_v54, %v3592_v5  ;;  %v3656_v50 = vsel %vm3579_vm1, %v2038_v49, 0.0  ;;  %v2040_v19 = vpop.f32.mrb[50].mxu1  ;;  %v2228_v18 = vpop.f32.mrb[56].mxu0 }
 0x34b   :  { %v3657_v17 = vadd.f32 %v3656_v50, %v3655_v12  ;;  %v2041_v56 = vpop.f32.mrb[51].mxu1  ;;  %v2230_v23 = vpop.f32.mrb[57].mxu0  ;;  %v3599_v34 = vsel %vm3579_vm1, %v2228_v18, 0.0 }
 0x34c   :  { %v3596_v25 = vadd.f32 %v3595_v16, %v3594_v15  ;;  %v2232_v26 = vpop.f32.mrb[58].mxu0  ;;  %v3662_v20 = vsel %vm3579_vm1, %v2230_v23, 0.0 }
 0x34d   :  { %v3659_v27 = vadd.f32 %v3658_v21, %v3657_v17  ;;  %v2233_v10 = vpop.f32.mrb[59].mxu0 }
 0x350   :  { %v2164_v28 = vpop.f32.mrb[52].mxu1 }
 0x351   :  { %v3597_v8 = vsel %vm3579_vm1, %v2164_v28, 0.0  ;;  %v2166_v6 = vpop.f32.mrb[53].mxu1 }
 0x352   :  { %v3598_v52 = vadd.f32 %v3597_v8, %v3596_v25  ;;  %v3660_v31 = vsel %vm3579_vm1, %v2166_v6, 0.0  ;;  %v2168_v33 = vpop.f32.mrb[54].mxu1  ;;  %v2356_v36 = vpop.f32.mrb[60].mxu0 }
 0x353   :  { %v3661_v35 = vadd.f32 %v3660_v31, %v3659_v27  ;;  %v2169_v7 = vpop.f32.mrb[55].mxu1  ;;  %v2358_v37 = vpop.f32.mrb[61].mxu0  ;;  %v3603_v45 = vsel %vm3579_vm1, %v2356_v36, 0.0 }
 0x354   :  { %v3600_v39 = vadd.f32 %v3599_v34, %v3598_v52  ;;  %v2360_v22 = vpop.f32.mrb[62].mxu0  ;;  %v3666_v53 = vsel %vm3579_vm1, %v2358_v37, 0.0 }
 0x355   :  { %v3663_v41 = vadd.f32 %v3662_v20, %v3661_v35  ;;  %v2361_v32 = vpop.f32.mrb[63].mxu0 }
 0x358   :  { %v2292_v9 = vpop.f32.mrb[56].mxu1 }
 0x359   :  { %v3601_v42 = vsel %vm3579_vm1, %v2292_v9, 0.0  ;;  %v2294_v43 = vpop.f32.mrb[57].mxu1 }
 0x35a   :  { %v3602_v29 = vadd.f32 %v3601_v42, %v3600_v39  ;;  %v3664_v44 = vsel %vm3579_vm1, %v2294_v43, 0.0  ;;  %v2296_v24 = vpop.f32.mrb[58].mxu1  ;;  %v2484_v47 = vpop.f32.mrb[64].mxu0 }
 0x35b   :  { %v3665_v46 = vadd.f32 %v3664_v44, %v3663_v41  ;;  %v2297_v51 = vpop.f32.mrb[59].mxu1  ;;  %v2486_v55 = vpop.f32.mrb[65].mxu0  ;;  %v3607_v0 = vsel %vm3579_vm1, %v2484_v47, 0.0 }
 0x35c   :  { %v3604_v57 = vadd.f32 %v3603_v45, %v3602_v29  ;;  %v2488_v38 = vpop.f32.mrb[66].mxu0  ;;  %v3670_v4 = vsel %vm3579_vm1, %v2486_v55, 0.0 }
 0x35d   :  { %v3667_v58 = vadd.f32 %v3666_v53, %v3665_v46  ;;  %v2489_v59 = vpop.f32.mrb[67].mxu0 }
 0x360   :  { %v2420_v60 = vpop.f32.mrb[60].mxu1 }
 0x361   :  { %v3605_v48 = vsel %vm3579_vm1, %v2420_v60, 0.0  ;;  %v2422_v61 = vpop.f32.mrb[61].mxu1 }
 0x362   :  { %v3606_v40 = vadd.f32 %v3605_v48, %v3604_v57  ;;  %v3668_v63 = vsel %vm3579_vm1, %v2422_v61, 0.0  ;;  %v2424_v30 = vpop.f32.mrb[62].mxu1  ;;  %v2612_v2 = vpop.f32.mrb[68].mxu0 }
 0x363   :  { %v3669_v1 = vadd.f32 %v3668_v63, %v3667_v58  ;;  %v2425_v3 = vpop.f32.mrb[63].mxu1  ;;  %v2614_v5 = vpop.f32.mrb[69].mxu0  ;;  %v3611_v17 = vsel %vm3579_vm1, %v2612_v2, 0.0 }
 0x364   :  { %v3608_v11 = vadd.f32 %v3607_v0, %v3606_v40  ;;  %v2616_v12 = vpop.f32.mrb[70].mxu0  ;;  %v3674_v23 = vsel %vm3579_vm1, %v2614_v5, 0.0 }
 0x365   :  { %v3671_v13 = vadd.f32 %v3670_v4, %v3669_v1  ;;  %v2617_v14 = vpop.f32.mrb[71].mxu0 }
 0x368   :  { %v2548_v54 = vpop.f32.mrb[64].mxu1 }
 0x369   :  { %v3609_v49 = vsel %vm3579_vm1, %v2548_v54, 0.0  ;;  %v2550_v15 = vpop.f32.mrb[65].mxu1 }
 0x36a   :  { %v3610_v50 = vadd.f32 %v3609_v49, %v3608_v11  ;;  %v3672_v19 = vsel %vm3579_vm1, %v2550_v15, 0.0  ;;  %v2552_v16 = vpop.f32.mrb[66].mxu1  ;;  %v2740_v56 = vpop.f32.mrb[72].mxu0 }
 0x36b   :  { %v3673_v18 = vadd.f32 %v3672_v19, %v3671_v13  ;;  %v2553_v21 = vpop.f32.mrb[67].mxu1  ;;  %v2742_v25 = vpop.f32.mrb[73].mxu0  ;;  %v3615_v35 = vsel %vm3579_vm1, %v2740_v56, 0.0 }
 0x36c   :  { %v3612_v26 = vadd.f32 %v3611_v17, %v3610_v50  ;;  %v2744_v27 = vpop.f32.mrb[74].mxu0  ;;  %v3678_v37 = vsel %vm3579_vm1, %v2742_v25, 0.0 }
 0x36d   :  { %v3675_v10 = vadd.f32 %v3674_v23, %v3673_v18  ;;  %v2745_v28 = vpop.f32.mrb[75].mxu0 }
 0x370   :  { %v2676_v8 = vpop.f32.mrb[68].mxu1 }
 0x371   :  { %v3613_v6 = vsel %vm3579_vm1, %v2676_v8, 0.0  ;;  %v2678_v52 = vpop.f32.mrb[69].mxu1 }
 0x372   :  { %v3614_v31 = vadd.f32 %v3613_v6, %v3612_v26  ;;  %v3676_v33 = vsel %vm3579_vm1, %v2678_v52, 0.0  ;;  %v2680_v34 = vpop.f32.mrb[70].mxu1  ;;  %v2868_v7 = vpop.f32.mrb[76].mxu0 }
 0x373   :  { %v3677_v36 = vadd.f32 %v3676_v33, %v3675_v10  ;;  %v2681_v20 = vpop.f32.mrb[71].mxu1  ;;  %v2870_v39 = vpop.f32.mrb[77].mxu0  ;;  %v3619_v46 = vsel %vm3579_vm1, %v2868_v7, 0.0 }
 0x374   :  { %v3616_v22 = vadd.f32 %v3615_v35, %v3614_v31  ;;  %v2872_v41 = vpop.f32.mrb[78].mxu0  ;;  %v3682_v55 = vsel %vm3579_vm1, %v2870_v39, 0.0 }
 0x375   :  { %v3679_v32 = vadd.f32 %v3678_v37, %v3677_v36  ;;  %v2873_v9 = vpop.f32.mrb[79].mxu0 }
 0x378   :  { %v2804_v42 = vpop.f32.mrb[72].mxu1 }
 0x379   :  { %v3617_v43 = vsel %vm3579_vm1, %v2804_v42, 0.0  ;;  %v2806_v29 = vpop.f32.mrb[73].mxu1 }
 0x37a   :  { %v3618_v44 = vadd.f32 %v3617_v43, %v3616_v22  ;;  %v3680_v24 = vsel %vm3579_vm1, %v2806_v29, 0.0  ;;  %v2808_v45 = vpop.f32.mrb[74].mxu1  ;;  %v2996_v51 = vpop.f32.mrb[80].mxu0 }
 0x37b   :  { %v3681_v47 = vadd.f32 %v3680_v24, %v3679_v32  ;;  %v2809_v53 = vpop.f32.mrb[75].mxu1  ;;  %v2998_v57 = vpop.f32.mrb[81].mxu0  ;;  %v3623_v1 = vsel %vm3579_vm1, %v2996_v51, 0.0 }
 0x37c   :  { %v3620_v38 = vadd.f32 %v3619_v46, %v3618_v44  ;;  %v3000_v58 = vpop.f32.mrb[82].mxu0  ;;  %v3686_v5 = vsel %vm3579_vm1, %v2998_v57, 0.0 }
 0x37d   :  { %v3683_v59 = vadd.f32 %v3682_v55, %v3681_v47  ;;  %v3001_v60 = vpop.f32.mrb[83].mxu0 }
 0x380   :  { %v2932_v48 = vpop.f32.mrb[76].mxu1 }
 0x381   :  { %v3621_v61 = vsel %vm3579_vm1, %v2932_v48, 0.0  ;;  %v2934_v40 = vpop.f32.mrb[77].mxu1 }
 0x382   :  { %v3622_v63 = vadd.f32 %v3621_v61, %v3620_v38  ;;  %v3684_v30 = vsel %vm3579_vm1, %v2934_v40, 0.0  ;;  %v2936_v0 = vpop.f32.mrb[78].mxu1  ;;  %v3124_v3 = vpop.f32.mrb[84].mxu0 }
 0x383   :  { %v3685_v2 = vadd.f32 %v3684_v30, %v3683_v59  ;;  %v2937_v4 = vpop.f32.mrb[79].mxu1  ;;  %v3126_v11 = vpop.f32.mrb[85].mxu0  ;;  %v3627_v18 = vsel %vm3579_vm1, %v3124_v3, 0.0 }
 0x384   :  { %v3624_v12 = vadd.f32 %v3623_v1, %v3622_v63  ;;  %v3128_v13 = vpop.f32.mrb[86].mxu0  ;;  %v3690_v25 = vsel %vm3579_vm1, %v3126_v11, 0.0 }
 0x385   :  { %v3687_v14 = vadd.f32 %v3686_v5, %v3685_v2  ;;  %v3129_v54 = vpop.f32.mrb[87].mxu0  ;;  %v362_v13 = vld [vmem:[#allocation7 + $0x2] ss:$4 sm:$0x3] }
 0x386   :  { %v3713_v54 = vsub.s32 1, %v4668_v62 }
 0x388   :  { %v3060_v49 = vpop.f32.mrb[80].mxu1 }
 0x389   :  { %v3625_v15 = vsel %vm3579_vm1, %v3060_v49, 0.0  ;;  %v3062_v50 = vpop.f32.mrb[81].mxu1 }
 0x38a   :  { %v3626_v19 = vadd.f32 %v3625_v15, %v3624_v12  ;;  %v3688_v16 = vsel %vm3579_vm1, %v3062_v50, 0.0  ;;  %v3064_v17 = vpop.f32.mrb[82].mxu1  ;;  %v3252_v21 = vpop.f32.mrb[88].mxu0  ;;  %v3709_v12 = vsub.s32 0, %v4668_v62 }
 0x38b   :  { %v3689_v56 = vadd.f32 %v3688_v16, %v3687_v14  ;;  %v3065_v23 = vpop.f32.mrb[83].mxu1  ;;  %v3254_v26 = vpop.f32.mrb[89].mxu0  ;;  %v3631_v36 = vsel %vm3579_vm1, %v3252_v21, 0.0  ;;  %v3714_v16 = vrot.slane %v362_v13, %v3713_v54 }
 0x38c   :  { %v3628_v27 = vadd.f32 %v3627_v18, %v3626_v19  ;;  %v3256_v10 = vpop.f32.mrb[90].mxu0  ;;  %v3694_v39 = vsel %vm3579_vm1, %v3254_v26, 0.0  ;;  %v3710_v15 = vrot.slane %v362_v13, %v3709_v12 }
 0x38d   :  { %v3691_v28 = vadd.f32 %v3690_v25, %v3689_v56  ;;  %v3257_v8 = vpop.f32.mrb[91].mxu0 }
 0x390   :  { %v3188_v6 = vpop.f32.mrb[84].mxu1 }
 0x391   :  { %v3629_v52 = vsel %vm3579_vm1, %v3188_v6, 0.0  ;;  %v3190_v31 = vpop.f32.mrb[85].mxu1 }
 0x392   :  { %v3630_v33 = vadd.f32 %v3629_v52, %v3628_v27  ;;  %v3692_v34 = vsel %vm3579_vm1, %v3190_v31, 0.0  ;;  %v3192_v35 = vpop.f32.mrb[86].mxu1  ;;  %v3380_v20 = vpop.f32.mrb[92].mxu0 }
 0x393   :  { %v3693_v7 = vadd.f32 %v3692_v34, %v3691_v28  ;;  %v3193_v37 = vpop.f32.mrb[87].mxu1  ;;  %v3382_v22 = vpop.f32.mrb[93].mxu0  ;;  %v3635_v47 = vsel %vm3579_vm1, %v3380_v20, 0.0 }
 0x394   :  { %v3632_v41 = vadd.f32 %v3631_v36, %v3630_v33  ;;  %v3384_v32 = vpop.f32.mrb[94].mxu0  ;;  %v3698_v57 = vsel %vm3579_vm1, %v3382_v22, 0.0 }
 0x395   :  { %v3695_v9 = vadd.f32 %v3694_v39, %v3693_v7  ;;  %v3385_v42 = vpop.f32.mrb[95].mxu0 }
 0x398   :  { %v3316_v43 = vpop.f32.mrb[88].mxu1 }
 0x399   :  { %v3633_v29 = vsel %vm3579_vm1, %v3316_v43, 0.0  ;;  %v3318_v44 = vpop.f32.mrb[89].mxu1 }
 0x39a   :  { %v3634_v24 = vadd.f32 %v3633_v29, %v3632_v41  ;;  %v3696_v45 = vsel %vm3579_vm1, %v3318_v44, 0.0  ;;  %v3320_v46 = vpop.f32.mrb[90].mxu1  ;;  %v3508_v53 = vpop.f32.mrb[96].mxu0 }
 0x39b   :  { %v3697_v51 = vadd.f32 %v3696_v45, %v3695_v9  ;;  %v3321_v55 = vpop.f32.mrb[91].mxu1  ;;  %v3510_v38 = vpop.f32.mrb[97].mxu0  ;;  %v3639_v2 = vsel %vm3579_vm1, %v3508_v53, 0.0 }
 0x39c   :  { %v3636_v58 = vadd.f32 %v3635_v47, %v3634_v24  ;;  %v3512_v59 = vpop.f32.mrb[98].mxu0  ;;  %v3702_v5 = vsel %vm3579_vm1, %v3510_v38, 0.0 }
 0x39d   :  { %v3699_v60 = vadd.f32 %v3698_v57, %v3697_v51  ;;  %v3513_v48 = vpop.f32.mrb[99].mxu0 }
 0x3a0   :  { %v3444_v61 = vpop.f32.mrb[92].mxu1 }
 0x3a1   :  { %v3637_v40 = vsel %vm3579_vm1, %v3444_v61, 0.0  ;;  %v3446_v63 = vpop.f32.mrb[93].mxu1 }
 0x3a2   :  { %v3638_v30 = vadd.f32 %v3637_v40, %v3636_v58  ;;  %v3700_v0 = vsel %vm3579_vm1, %v3446_v63, 0.0  ;;  %v3448_v1 = vpop.f32.mrb[94].mxu1 }
 0x3a3   :  { %v3701_v3 = vadd.f32 %v3700_v0, %v3699_v60  ;;  %v3449_v4 = vpop.f32.mrb[95].mxu1 }
 0x3a4   :  { %v3640_v11 = vadd.f32 %v3639_v2, %v3638_v30 }
 0x3a5   :  { %v3703_v14 = vadd.f32 %v3702_v5, %v3701_v3 }
 0x3a8   :  { %v3572_v49 = vpop.f32.mrb[96].mxu1 }
 0x3a9   :  { %v3641_v50 = vsel %vm3579_vm1, %v3572_v49, 0.0  ;;  %v3574_v19 = vpop.f32.mrb[97].mxu1 }
 0x3aa   :  { %v3642_v17 = vadd.f32 %v3641_v50, %v3640_v11  ;;  %v3704_v18 = vsel %vm3579_vm1, %v3574_v19, 0.0  ;;  %v3576_v56 = vpop.f32.mrb[98].mxu1 }
 0x3ab   :  { %v3705_v21 = vadd.f32 %v3704_v18, %v3703_v14  ;;  %v3577_v23 = vpop.f32.mrb[99].mxu1 }
 0x3ac   :  { %v3717_v25 = vadd.f32 %v3710_v15, %v3642_v17 }
 0x3ad   :  { %v3718_v26 = vadd.f32 %v3714_v16, %v3705_v21 }
 0x3ae   :  { %v3719_v27 = vmax.f32 %v3717_v25, 0.0 }
 0x3af   :  { %v3720_v10 = vmax.f32 %v3718_v26, 0.0 }
 0x3b1   :  { %v3723_v28 = vcombine.low %v3719_v27, %v3720_v10 }
 0x3b3   :  { %4015 = vst.sshfl [vmem:[#allocation8] sm:$0x33 pattern:$0x76325410] %v3723_v28 }
 0x3b4   :  { %4564 = shalt.err (!%p4561_p0)
}
 0x3b5   :  { %s4565_s27 = scalar_lea.hbm %s4915_s3, 64 }
 0x3b6   :  { %p4566_p1 = scmp.ne.s32.totalorder %s4915_s3, %s4565_s27  ;;  %p4569_p2 = scmp.lt.u32.totalorder %s4565_s27, %s4915_s3 }
 0x3b8   :  { %p4571_p3 = pnand %p4569_p2, %p4566_p1 }
 0x3ba   :  { %4574 = shalt.err (!%p4571_p3)
}
 0x3bb   :  { %3742 = dma.vmem_to_hbm [thread:$0]  %s3740_s23, 64, %s4915_s3, [#allocation4]  }
 0x3bc   :  { %4579 = dma.done.wait [#allocation4], 64  }
 0x3bd   :  { %4580 = vsyncadd [#allocation4], 4294967232 }
 0x3be   :  { %3746 = vsyncpa [#allocation3], 1 }
 0x3bf   :  { %3747 = vsyncpa [#allocation6], 1 }
 0x3c0   :  { %3748 = vsyncpa [#allocation4], 1 }

</bundles_post_ra>
